<compile_context>
chip_gen: v6e
topology: v6e:2x2x1
jax: 0.10.0
libtpu: 0.0.40
codegen_flags: <defaults>
</compile_context>

<pallas_src>
import math

import jax
import jax.numpy as jnp
from jax import lax
from jax.experimental import pallas as pl
from jax.experimental.pallas import tpu as pltpu


# ----------------------------------------------------------------------------
# Pallas kernel: one batch block, both directions, full recurrence in VMEM.
# ----------------------------------------------------------------------------
def _pblstm_kernel(x_ref, wih_ref, whhf_ref, whhb_ref, b_ref,
                   y_ref, hn_ref, cn_ref,
                   gates_scr, ysf_scr, ysb_scr):
    # x_ref:     (Tp, TB, F2)   time-major input block (F2 = 2*F)
    # wih_ref:   (F2, 8H)       [W_ih_fwd | W_ih_bwd], transposed, matmul dtype
    # whhf_ref:  (H, 4H)        recurrent weights, forward direction
    # whhb_ref:  (H, 4H)        recurrent weights, backward direction
    # b_ref:     (1, 8H)        b_ih + b_hh for both directions (f32)
    # y_ref:     (Tp, TB, 2H)   output block (fwd ++ bwd along features)
    # hn_ref:    (2, TB, H)     final hidden state per direction
    # cn_ref:    (2, TB, H)     final cell state per direction
    # gates_scr: (Tp, TB, 8H)   VMEM scratch: precomputed input projection + bias
    # ysf_scr:   (Tp, TB, H)    VMEM scratch: forward outputs
    # ysb_scr:   (Tp, TB, H)    VMEM scratch: backward outputs
    Tp, TB, F2 = x_ref.shape
    H4 = whhf_ref.shape[1]          # 4H
    H = H4 // 4
    mm_dtype = whhf_ref.dtype       # matmul operand dtype (bf16 or f32)

    # ---- hoisted input projection: one big MXU GEMM for both directions ----
    x2d = x_ref[...].reshape(Tp * TB, F2)
    proj = jnp.dot(x2d, wih_ref[...], preferred_element_type=jnp.float32)
    gates_scr[...] = (proj + b_ref[...]).reshape(Tp, TB, 2 * H4)

    def lstm_cell(gates, c):
        # PyTorch gate order: i, f, g, o.  Gate math stays f32 (v5e-safe).
        # NOTE: for production sizes pad H to a multiple of 128 so these H-wide
        # lane slices are full vregs instead of masked sub-slices.
        i_g = jax.nn.sigmoid(gates[:, 0 * H:1 * H])
        f_g = jax.nn.sigmoid(gates[:, 1 * H:2 * H])
        g_g = jnp.tanh(gates[:, 2 * H:3 * H])
        o_g = jax.nn.sigmoid(gates[:, 3 * H:4 * H])
        c_new = f_g * c + i_g * g_g
        h_new = o_g * jnp.tanh(c_new)
        return h_new, c_new

    def step(i, carry):
        # Interleave the two directions: fwd at time i, bwd at time Tp-1-i.
        h_f, c_f, h_b, c_b = carry
        t_b = Tp - 1 - i
        g_f = gates_scr[i]          # (TB, 8H) dynamic leading-axis load
        g_b = gates_scr[t_b]
        pre_f = g_f[:, :H4] + jnp.dot(h_f.astype(mm_dtype), whhf_ref[...],
                                      preferred_element_type=jnp.float32)
        pre_b = g_b[:, H4:] + jnp.dot(h_b.astype(mm_dtype), whhb_ref[...],
                                      preferred_element_type=jnp.float32)
        h_f, c_f = lstm_cell(pre_f, c_f)
        h_b, c_b = lstm_cell(pre_b, c_b)
        ysf_scr[i] = h_f            # per-step ref stores, no big loop carry
        ysb_scr[t_b] = h_b
        return h_f, c_f, h_b, c_b

    zeros = jnp.zeros((TB, H), jnp.float32)
    h_f, c_f, h_b, c_b = lax.fori_loop(
        0, Tp, step, (zeros, zeros, zeros, zeros),
        unroll=True if Tp <= 64 else False)

    # One contiguous (lane-concat) output store per block.
    y_ref[...] = jnp.concatenate([ysf_scr[...], ysb_scr[...]],
                                 axis=-1).astype(y_ref.dtype)
    hn_ref[0] = h_f.astype(hn_ref.dtype)
    hn_ref[1] = h_b.astype(hn_ref.dtype)
    cn_ref[0] = c_f.astype(cn_ref.dtype)
    cn_ref[1] = c_b.astype(cn_ref.dtype)


# ----------------------------------------------------------------------------
# Wrapper: pyramid reshape, layout plumbing, batch-parallel grid.
# ----------------------------------------------------------------------------
def pblstm_forward(x, params, *, batch_block=None, matmul_dtype=jnp.bfloat16):
    """x: (B, T, F) float32.  Returns (output, (h_n, c_n)) like the PyTorch module."""
    w_ih, w_hh, b_ih, b_hh = params       # (2,4H,2F), (2,4H,H), (2,4H), (2,4H)
    B, T, F = x.shape
    Tp = T // 2
    F2 = 2 * F
    H = w_hh.shape[-1]
    H4 = 4 * H

    if batch_block is None:
        batch_block = min(B, 8)
    TB = math.gcd(B, batch_block)         # batch tile size (divides B)
    NB = B // TB                          # number of batch blocks = grid size

    # Pyramid reshape (== .view(B, T//2, 2F)), then expose
    # (batch-block, time, in-block-batch, feature) so the kernel is time-major and
    # the grid tiles the leading batch-block axis.
    x2 = x.reshape(B, Tp, F2)
    x4 = x2.reshape(NB, TB, Tp, F2).transpose(0, 2, 1, 3).astype(matmul_dtype)

    # Weights: fuse both directions' input projections into one GEMM operand.
    wih_cat = jnp.concatenate([w_ih[0].T, w_ih[1].T], axis=1).astype(matmul_dtype)  # (F2, 8H)
    whh_f = w_hh[0].T.astype(matmul_dtype)                                          # (H, 4H)
    whh_b = w_hh[1].T.astype(matmul_dtype)                                          # (H, 4H)
    bias = jnp.concatenate([b_ih[0] + b_hh[0],
                            b_ih[1] + b_hh[1]])[None, :].astype(jnp.float32)        # (1, 8H)

    # Rough VMEM budget; raise the scoped limit only when blocks actually need it.
    mm_bytes = jnp.dtype(matmul_dtype).itemsize
    est = (2 * Tp * TB * F2 * mm_bytes            # x block (double-buffered)
           + 2 * Tp * TB * 2 * H * 4              # y block
           + 4 * 2 * TB * H * 4                   # h_n / c_n blocks
           + (F2 * 8 * H + 2 * H * H4) * mm_bytes + 8 * H * 4   # weights + bias
           + Tp * TB * 8 * H * 4 + 2 * Tp * TB * H * 4)         # VMEM scratch
    vmem_limit = None
    if est > 24 * 1024 * 1024:
        # v6e default scoped limit is 32 MiB of 128 MiB physical.  On v7x
        # (64 MiB per core) prefer shrinking batch_block instead of raising this.
        vmem_limit = min(int(1.5 * est), 96 * 1024 * 1024)

    out_shapes = (
        jax.ShapeDtypeStruct((NB, Tp, TB, 2 * H), jnp.float32),   # y (time-major blocks)
        jax.ShapeDtypeStruct((NB, 2, TB, H), jnp.float32),        # h_n (batch-block major)
        jax.ShapeDtypeStruct((NB, 2, TB, H), jnp.float32),        # c_n
    )

    y4, hn4, cn4 = pl.pallas_call(
        _pblstm_kernel,
        out_shape=out_shapes,
        grid=(NB,),
        in_specs=[
            pl.BlockSpec((None, Tp, TB, F2), lambda b: (b, 0, 0, 0)),   # x
            pl.BlockSpec((F2, 8 * H), lambda b: (0, 0)),                # W_ih (both dirs)
            pl.BlockSpec((H, H4), lambda b: (0, 0)),                    # W_hh fwd
            pl.BlockSpec((H, H4), lambda b: (0, 0)),                    # W_hh bwd
            pl.BlockSpec((1, 8 * H), lambda b: (0, 0)),                 # bias
        ],
        out_specs=(
            pl.BlockSpec((None, Tp, TB, 2 * H), lambda b: (b, 0, 0, 0)),
            pl.BlockSpec((None, 2, TB, H), lambda b: (b, 0, 0, 0)),
            pl.BlockSpec((None, 2, TB, H), lambda b: (b, 0, 0, 0)),
        ),
        scratch_shapes=[
            pltpu.VMEM((Tp, TB, 8 * H), jnp.float32),   # hoisted input projection
            pltpu.VMEM((Tp, TB, H), jnp.float32),       # forward outputs
            pltpu.VMEM((Tp, TB, H), jnp.float32),       # backward outputs
        ],
        compiler_params=pltpu.CompilerParams(
            dimension_semantics=("parallel",),
            vmem_limit_bytes=vmem_limit),
    )(x4, wih_cat, whh_f, whh_b, bias)

    # Cheap XLA-side layout restore: (NB,Tp,TB,2H)->(B,Tp,2H), (NB,2,TB,H)->(2,B,H).
    y = y4.transpose(0, 2, 1, 3).reshape(B, Tp, 2 * H)
    h_n = hn4.transpose(1, 0, 2, 3).reshape(2, B, H)
    c_n = cn4.transpose(1, 0, 2, 3).reshape(2, B, H)
    return y, (h_n, c_n)


# ----------------------------------------------------------------------------
# Pure-JAX f32 reference (same math, lax.scan) for correctness checks.
# ----------------------------------------------------------------------------
def pblstm_reference(x, params):
    w_ih, w_hh, b_ih, b_hh = params
    B, T, F = x.shape
    Tp = T // 2
    H = w_hh.shape[-1]
    x2 = x.reshape(B, Tp, 2 * F).astype(jnp.float32)

    def run_dir(d, xs):
        wi, wh = w_ih[d].T, w_hh[d].T
        b = (b_ih[d] + b_hh[d])[None, :]

        def step(carry, xt):
            h, c = carry
            g = xt @ wi + h @ wh + b
            i_g = jax.nn.sigmoid(g[:, 0 * H:1 * H])
            f_g = jax.nn.sigmoid(g[:, 1 * H:2 * H])
            g_g = jnp.tanh(g[:, 2 * H:3 * H])
            o_g = jax.nn.sigmoid(g[:, 3 * H:4 * H])
            c = f_g * c + i_g * g_g
            h = o_g * jnp.tanh(c)
            return (h, c), h

        init = (jnp.zeros((B, H), jnp.float32), jnp.zeros((B, H), jnp.float32))
        (h, c), ys = lax.scan(step, init, jnp.swapaxes(xs, 0, 1))
        return h, c, jnp.swapaxes(ys, 0, 1)

    h_f, c_f, y_f = run_dir(0, x2)
    h_b, c_b, y_b = run_dir(1, x2[:, ::-1, :])
    y = jnp.concatenate([y_f, y_b[:, ::-1, :]], axis=-1)
    return y, (jnp.stack([h_f, h_b]), jnp.stack([c_f, c_b]))


def init_params(key, input_feature_dim, hidden_dim):
    """Deterministic init matching nn.LSTM shapes: uniform(-1/sqrt(H), 1/sqrt(H))."""
    H = hidden_dim
    in_size = 2 * input_feature_dim   # module builds LSTM(input_feature_dim*2, H)
    k = 1.0 / math.sqrt(H)
    ks = jax.random.split(key, 8)

    def u(kk, shape):
        return jax.random.uniform(kk, shape, jnp.float32, -k, k)

    w_ih = jnp.stack([u(ks[0], (4 * H, in_size)), u(ks[4], (4 * H, in_size))])
    w_hh = jnp.stack([u(ks[1], (4 * H, H)), u(ks[5], (4 * H, H))])
    b_ih = jnp.stack([u(ks[2], (4 * H,)), u(ks[6], (4 * H,))])
    b_hh = jnp.stack([u(ks[3], (4 * H,)), u(ks[7], (4 * H,))])
    return w_ih, w_hh, b_ih, b_hh


if __name__ == "__main__":
    B, T, F, H = 2, 8, 16, 32   # input_feature_dim=16, hidden_dim=32
    key = jax.random.PRNGKey(0)
    kx, kp = jax.random.split(key)
    x = jax.random.normal(kx, (B, T, F), dtype=jnp.float32)
    params = init_params(kp, F, H)

    y_ref, (h_ref, c_ref) = pblstm_reference(x, params)

    # bf16-MXU path (default), batch_block=1 -> grid=(2,) exercises the parallel grid.
    y, (h_n, c_n) = pblstm_forward(x, params, batch_block=1)
    jax.block_until_ready((y, h_n, c_n))
    assert y.shape == (B, T // 2, 2 * H)
    assert h_n.shape == (2, B, H) and c_n.shape == (2, B, H)
    assert jnp.allclose(y, y_ref, atol=8e-2, rtol=8e-2), float(jnp.max(jnp.abs(y - y_ref)))
    assert jnp.allclose(h_n, h_ref, atol=8e-2, rtol=8e-2)
    assert jnp.allclose(c_n, c_ref, atol=8e-2, rtol=8e-2)

    # Full-f32 path, whole batch in one block: tight numerical check vs the reference.
    y32, (h32, c32) = pblstm_forward(x, params, batch_block=2,
                                     matmul_dtype=jnp.float32)
    jax.block_until_ready((y32, h32, c32))
    assert jnp.allclose(y32, y_ref, atol=2e-3, rtol=2e-3), float(jnp.max(jnp.abs(y32 - y_ref)))
    assert jnp.allclose(h32, h_ref, atol=2e-3, rtol=2e-3)
    assert jnp.allclose(c32, c_ref, atol=2e-3, rtol=2e-3)

    # TODO(synk): nn.LSTM dropout is a between-layers op; with num_layers=1 it is a
    # no-op, so nothing is implemented for it.
    print("KERNEL_OK")
</pallas_src>

<mosaic_0001>
module attributes {stable_mosaic.version = 11 : i64} {
  func.func @_pblstm_kernel(%arg0: i32, %arg1: memref<1x4x1x32xbf16, #tpu.memory_space<vmem>>, %arg2: memref<32x256xbf16, #tpu.memory_space<vmem>>, %arg3: memref<32x128xbf16, #tpu.memory_space<vmem>>, %arg4: memref<32x128xbf16, #tpu.memory_space<vmem>>, %arg5: memref<1x256xf32, #tpu.memory_space<vmem>>, %arg6: memref<1x4x1x64xf32, #tpu.memory_space<vmem>>, %arg7: memref<1x2x1x32xf32, #tpu.memory_space<vmem>>, %arg8: memref<1x2x1x32xf32, #tpu.memory_space<vmem>>, %arg9: memref<4x1x256xf32, #tpu.memory_space<vmem>>, %arg10: memref<4x1x32xf32, #tpu.memory_space<vmem>>, %arg11: memref<4x1x32xf32, #tpu.memory_space<vmem>>) attributes {dimension_semantics = [#tpu.dimension_semantics<parallel>], iteration_bounds = array<i64: 2>, scalar_prefetch = 0 : i64, scratch_operands = 3 : i64, tpu.core_type = #tpu.core_type<tc>, window_params = [{transform_indices = @transform_0, window_bounds = array<i64: 1, 4, 1, 32>}, {pipeline_mode = #tpu.pipeline_mode<synchronous>, transform_indices = @transform_1, window_bounds = array<i64: 32, 256>}, {pipeline_mode = #tpu.pipeline_mode<synchronous>, transform_indices = @transform_2, window_bounds = array<i64: 32, 128>}, {pipeline_mode = #tpu.pipeline_mode<synchronous>, transform_indices = @transform_3, window_bounds = array<i64: 32, 128>}, {pipeline_mode = #tpu.pipeline_mode<synchronous>, transform_indices = @transform_4, window_bounds = array<i64: 1, 256>}, {transform_indices = @transform_5, window_bounds = array<i64: 1, 4, 1, 64>}, {transform_indices = @transform_6, window_bounds = array<i64: 1, 2, 1, 32>}, {transform_indices = @transform_7, window_bounds = array<i64: 1, 2, 1, 32>}]} {
    %c0 = arith.constant 0 : index
    %c0_0 = arith.constant 0 : index
    %c0_1 = arith.constant 0 : index
    %c0_2 = arith.constant 0 : index
    %0 = vector.load %arg1[%c0, %c0_0, %c0_1, %c0_2] : memref<1x4x1x32xbf16, #tpu.memory_space<vmem>>, vector<1x4x1x32xbf16>
    %1 = vector.shape_cast %0 : vector<1x4x1x32xbf16> to vector<4x1x32xbf16>
    %2 = vector.shape_cast %1 : vector<4x1x32xbf16> to vector<4x32xbf16>
    %c0_3 = arith.constant 0 : index
    %c0_4 = arith.constant 0 : index
    %3 = vector.load %arg2[%c0_3, %c0_4] : memref<32x256xbf16, #tpu.memory_space<vmem>>, vector<32x256xbf16>
    %cst = arith.constant dense<0.000000e+00> : vector<4x256xf32>
    %4 = tpu.matmul %2, %3, %cst {dimension_numbers = #tpu.dot_dimension_numbers<[1], [0], [0], [1], [0, 0, 1, 1], [], []>} : vector<4x32xbf16>, vector<32x256xbf16>, vector<4x256xf32> -> vector<4x256xf32>
    %c0_5 = arith.constant 0 : index
    %c0_6 = arith.constant 0 : index
    %5 = vector.load %arg5[%c0_5, %c0_6] : memref<1x256xf32, #tpu.memory_space<vmem>>, vector<1x256xf32>
    %6 = vector.broadcast %5 : vector<1x256xf32> to vector<4x256xf32>
    %7 = arith.addf %4, %6 : vector<4x256xf32>
    %8 = vector.shape_cast %7 : vector<4x256xf32> to vector<4x1x256xf32>
    %c0_7 = arith.constant 0 : index
    %c0_8 = arith.constant 0 : index
    %c0_9 = arith.constant 0 : index
    %9 = vector.load %arg9[%c0_7, %c0_8, %c0_9] : memref<4x1x256xf32, #tpu.memory_space<vmem>>, vector<4x1x256xf32>
    tpu.vector_store %arg9[%c0_7, %c0_8, %c0_9], %8 {strides = array<i32>} : memref<4x1x256xf32, #tpu.memory_space<vmem>>, vector<4x1x256xf32>,
    %cst_10 = arith.constant 0.000000e+00 : f32
    %10 = vector.broadcast %cst_10 : f32 to vector<1x32xf32>
    %c0_i32 = arith.constant 0 : i32
    %c3_i32 = arith.constant 3 : i32
    %11 = arith.subi %c3_i32, %c0_i32 : i32
    %12 = arith.index_cast %c0_i32 : i32 to index
    %c0_11 = arith.constant 0 : index
    %c0_12 = arith.constant 0 : index
    %13 = vector.load %arg9[%12, %c0_11, %c0_12] : memref<4x1x256xf32, #tpu.memory_space<vmem>>, vector<1x1x256xf32>
    %14 = vector.shape_cast %13 : vector<1x1x256xf32> to vector<1x256xf32>
    %15 = arith.index_cast %11 : i32 to index
    %c0_13 = arith.constant 0 : index
    %c0_14 = arith.constant 0 : index
    %16 = vector.load %arg9[%15, %c0_13, %c0_14] : memref<4x1x256xf32, #tpu.memory_space<vmem>>, vector<1x1x256xf32>
    %17 = vector.shape_cast %16 : vector<1x1x256xf32> to vector<1x256xf32>
    %18 = vector.extract_strided_slice %14 {offsets = [0, 0], sizes = [1, 128], strides = [1, 1]} : vector<1x256xf32> to vector<1x128xf32>
    %19 = arith.truncf %10 : vector<1x32xf32> to vector<1x32xbf16>
    %c0_15 = arith.constant 0 : index
    %c0_16 = arith.constant 0 : index
    %20 = vector.load %arg3[%c0_15, %c0_16] : memref<32x128xbf16, #tpu.memory_space<vmem>>, vector<32x128xbf16>
    %cst_17 = arith.constant dense<0.000000e+00> : vector<1x128xf32>
    %21 = tpu.matmul %19, %20, %cst_17 {dimension_numbers = #tpu.dot_dimension_numbers<[1], [0], [0], [1], [0, 0, 1, 1], [], []>} : vector<1x32xbf16>, vector<32x128xbf16>, vector<1x128xf32> -> vector<1x128xf32>
    %22 = arith.addf %18, %21 : vector<1x128xf32>
    %23 = vector.extract_strided_slice %17 {offsets = [0, 128], sizes = [1, 128], strides = [1, 1]} : vector<1x256xf32> to vector<1x128xf32>
    %24 = arith.truncf %10 : vector<1x32xf32> to vector<1x32xbf16>
    %c0_18 = arith.constant 0 : index
    %c0_19 = arith.constant 0 : index
    %25 = vector.load %arg4[%c0_18, %c0_19] : memref<32x128xbf16, #tpu.memory_space<vmem>>, vector<32x128xbf16>
    %cst_20 = arith.constant dense<0.000000e+00> : vector<1x128xf32>
    %26 = tpu.matmul %24, %25, %cst_20 {dimension_numbers = #tpu.dot_dimension_numbers<[1], [0], [0], [1], [0, 0, 1, 1], [], []>} : vector<1x32xbf16>, vector<32x128xbf16>, vector<1x128xf32> -> vector<1x128xf32>
    %27 = arith.addf %23, %26 : vector<1x128xf32>
    %28 = vector.extract_strided_slice %22 {offsets = [0, 0], sizes = [1, 32], strides = [1, 1]} : vector<1x128xf32> to vector<1x32xf32>
    %29 = arith.negf %28 : vector<1x32xf32>
    %30 = math.exp %29 : vector<1x32xf32>
    %cst_21 = arith.constant 1.000000e+00 : f32
    %31 = vector.broadcast %cst_21 : f32 to vector<1x32xf32>
    %32 = arith.addf %31, %30 : vector<1x32xf32>
    %33 = arith.divf %31, %32 : vector<1x32xf32>
    %34 = vector.extract_strided_slice %22 {offsets = [0, 32], sizes = [1, 32], strides = [1, 1]} : vector<1x128xf32> to vector<1x32xf32>
    %35 = arith.negf %34 : vector<1x32xf32>
    %36 = math.exp %35 : vector<1x32xf32>
    %cst_22 = arith.constant 1.000000e+00 : f32
    %37 = vector.broadcast %cst_22 : f32 to vector<1x32xf32>
    %38 = arith.addf %37, %36 : vector<1x32xf32>
    %39 = arith.divf %37, %38 : vector<1x32xf32>
    %40 = vector.extract_strided_slice %22 {offsets = [0, 64], sizes = [1, 32], strides = [1, 1]} : vector<1x128xf32> to vector<1x32xf32>
    %41 = math.tanh %40 : vector<1x32xf32>
    %42 = vector.extract_strided_slice %22 {offsets = [0, 96], sizes = [1, 32], strides = [1, 1]} : vector<1x128xf32> to vector<1x32xf32>
    %43 = arith.negf %42 : vector<1x32xf32>
    %44 = math.exp %43 : vector<1x32xf32>
    %cst_23 = arith.constant 1.000000e+00 : f32
    %45 = vector.broadcast %cst_23 : f32 to vector<1x32xf32>
    %46 = arith.addf %45, %44 : vector<1x32xf32>
    %47 = arith.divf %45, %46 : vector<1x32xf32>
    %48 = arith.mulf %39, %10 : vector<1x32xf32>
    %49 = arith.mulf %33, %41 : vector<1x32xf32>
    %50 = arith.addf %48, %49 : vector<1x32xf32>
    %51 = math.tanh %50 : vector<1x32xf32>
    %52 = arith.mulf %47, %51 : vector<1x32xf32>
    %53 = vector.extract_strided_slice %27 {offsets = [0, 0], sizes = [1, 32], strides = [1, 1]} : vector<1x128xf32> to vector<1x32xf32>
    %54 = arith.negf %53 : vector<1x32xf32>
    %55 = math.exp %54 : vector<1x32xf32>
    %cst_24 = arith.constant 1.000000e+00 : f32
    %56 = vector.broadcast %cst_24 : f32 to vector<1x32xf32>
    %57 = arith.addf %56, %55 : vector<1x32xf32>
    %58 = arith.divf %56, %57 : vector<1x32xf32>
    %59 = vector.extract_strided_slice %27 {offsets = [0, 32], sizes = [1, 32], strides = [1, 1]} : vector<1x128xf32> to vector<1x32xf32>
    %60 = arith.negf %59 : vector<1x32xf32>
    %61 = math.exp %60 : vector<1x32xf32>
    %cst_25 = arith.constant 1.000000e+00 : f32
    %62 = vector.broadcast %cst_25 : f32 to vector<1x32xf32>
    %63 = arith.addf %62, %61 : vector<1x32xf32>
    %64 = arith.divf %62, %63 : vector<1x32xf32>
    %65 = vector.extract_strided_slice %27 {offsets = [0, 64], sizes = [1, 32], strides = [1, 1]} : vector<1x128xf32> to vector<1x32xf32>
    %66 = math.tanh %65 : vector<1x32xf32>
    %67 = vector.extract_strided_slice %27 {offsets = [0, 96], sizes = [1, 32], strides = [1, 1]} : vector<1x128xf32> to vector<1x32xf32>
    %68 = arith.negf %67 : vector<1x32xf32>
    %69 = math.exp %68 : vector<1x32xf32>
    %cst_26 = arith.constant 1.000000e+00 : f32
    %70 = vector.broadcast %cst_26 : f32 to vector<1x32xf32>
    %71 = arith.addf %70, %69 : vector<1x32xf32>
    %72 = arith.divf %70, %71 : vector<1x32xf32>
    %73 = arith.mulf %64, %10 : vector<1x32xf32>
    %74 = arith.mulf %58, %66 : vector<1x32xf32>
    %75 = arith.addf %73, %74 : vector<1x32xf32>
    %76 = math.tanh %75 : vector<1x32xf32>
    %77 = arith.mulf %72, %76 : vector<1x32xf32>
    %78 = arith.index_cast %c0_i32 : i32 to index
    %c0_27 = arith.constant 0 : index
    %c0_28 = arith.constant 0 : index
    %79 = vector.load %arg10[%78, %c0_27, %c0_28] : memref<4x1x32xf32, #tpu.memory_space<vmem>>, vector<1x1x32xf32>
    %80 = vector.shape_cast %79 : vector<1x1x32xf32> to vector<1x32xf32>
    %81 = vector.shape_cast %52 : vector<1x32xf32> to vector<1x1x32xf32>
    tpu.vector_store %arg10[%78, %c0_27, %c0_28], %81 {strides = array<i32>} : memref<4x1x32xf32, #tpu.memory_space<vmem>>, vector<1x1x32xf32>,
    %82 = arith.index_cast %11 : i32 to index
    %c0_29 = arith.constant 0 : index
    %c0_30 = arith.constant 0 : index
    %83 = vector.load %arg11[%82, %c0_29, %c0_30] : memref<4x1x32xf32, #tpu.memory_space<vmem>>, vector<1x1x32xf32>
    %84 = vector.shape_cast %83 : vector<1x1x32xf32> to vector<1x32xf32>
    %85 = vector.shape_cast %77 : vector<1x32xf32> to vector<1x1x32xf32>
    tpu.vector_store %arg11[%82, %c0_29, %c0_30], %85 {strides = array<i32>} : memref<4x1x32xf32, #tpu.memory_space<vmem>>, vector<1x1x32xf32>,
    %c1_i32 = arith.constant 1 : i32
    %c3_i32_31 = arith.constant 3 : i32
    %86 = arith.subi %c3_i32_31, %c1_i32 : i32
    %87 = arith.index_cast %c1_i32 : i32 to index
    %c0_32 = arith.constant 0 : index
    %c0_33 = arith.constant 0 : index
    %88 = vector.load %arg9[%87, %c0_32, %c0_33] : memref<4x1x256xf32, #tpu.memory_space<vmem>>, vector<1x1x256xf32>
    %89 = vector.shape_cast %88 : vector<1x1x256xf32> to vector<1x256xf32>
    %90 = arith.index_cast %86 : i32 to index
    %c0_34 = arith.constant 0 : index
    %c0_35 = arith.constant 0 : index
    %91 = vector.load %arg9[%90, %c0_34, %c0_35] : memref<4x1x256xf32, #tpu.memory_space<vmem>>, vector<1x1x256xf32>
    %92 = vector.shape_cast %91 : vector<1x1x256xf32> to vector<1x256xf32>
    %93 = vector.extract_strided_slice %89 {offsets = [0, 0], sizes = [1, 128], strides = [1, 1]} : vector<1x256xf32> to vector<1x128xf32>
    %94 = arith.truncf %52 : vector<1x32xf32> to vector<1x32xbf16>
    %c0_36 = arith.constant 0 : index
    %c0_37 = arith.constant 0 : index
    %95 = vector.load %arg3[%c0_36, %c0_37] : memref<32x128xbf16, #tpu.memory_space<vmem>>, vector<32x128xbf16>
    %cst_38 = arith.constant dense<0.000000e+00> : vector<1x128xf32>
    %96 = tpu.matmul %94, %95, %cst_38 {dimension_numbers = #tpu.dot_dimension_numbers<[1], [0], [0], [1], [0, 0, 1, 1], [], []>} : vector<1x32xbf16>, vector<32x128xbf16>, vector<1x128xf32> -> vector<1x128xf32>
    %97 = arith.addf %93, %96 : vector<1x128xf32>
    %98 = vector.extract_strided_slice %92 {offsets = [0, 128], sizes = [1, 128], strides = [1, 1]} : vector<1x256xf32> to vector<1x128xf32>
    %99 = arith.truncf %77 : vector<1x32xf32> to vector<1x32xbf16>
    %c0_39 = arith.constant 0 : index
    %c0_40 = arith.constant 0 : index
    %100 = vector.load %arg4[%c0_39, %c0_40] : memref<32x128xbf16, #tpu.memory_space<vmem>>, vector<32x128xbf16>
    %cst_41 = arith.constant dense<0.000000e+00> : vector<1x128xf32>
    %101 = tpu.matmul %99, %100, %cst_41 {dimension_numbers = #tpu.dot_dimension_numbers<[1], [0], [0], [1], [0, 0, 1, 1], [], []>} : vector<1x32xbf16>, vector<32x128xbf16>, vector<1x128xf32> -> vector<1x128xf32>
    %102 = arith.addf %98, %101 : vector<1x128xf32>
    %103 = vector.extract_strided_slice %97 {offsets = [0, 0], sizes = [1, 32], strides = [1, 1]} : vector<1x128xf32> to vector<1x32xf32>
    %104 = arith.negf %103 : vector<1x32xf32>
    %105 = math.exp %104 : vector<1x32xf32>
    %cst_42 = arith.constant 1.000000e+00 : f32
    %106 = vector.broadcast %cst_42 : f32 to vector<1x32xf32>
    %107 = arith.addf %106, %105 : vector<1x32xf32>
    %108 = arith.divf %106, %107 : vector<1x32xf32>
    %109 = vector.extract_strided_slice %97 {offsets = [0, 32], sizes = [1, 32], strides = [1, 1]} : vector<1x128xf32> to vector<1x32xf32>
    %110 = arith.negf %109 : vector<1x32xf32>
    %111 = math.exp %110 : vector<1x32xf32>
    %cst_43 = arith.constant 1.000000e+00 : f32
    %112 = vector.broadcast %cst_43 : f32 to vector<1x32xf32>
    %113 = arith.addf %112, %111 : vector<1x32xf32>
    %114 = arith.divf %112, %113 : vector<1x32xf32>
    %115 = vector.extract_strided_slice %97 {offsets = [0, 64], sizes = [1, 32], strides = [1, 1]} : vector<1x128xf32> to vector<1x32xf32>
    %116 = math.tanh %115 : vector<1x32xf32>
    %117 = vector.extract_strided_slice %97 {offsets = [0, 96], sizes = [1, 32], strides = [1, 1]} : vector<1x128xf32> to vector<1x32xf32>
    %118 = arith.negf %117 : vector<1x32xf32>
    %119 = math.exp %118 : vector<1x32xf32>
    %cst_44 = arith.constant 1.000000e+00 : f32
    %120 = vector.broadcast %cst_44 : f32 to vector<1x32xf32>
    %121 = arith.addf %120, %119 : vector<1x32xf32>
    %122 = arith.divf %120, %121 : vector<1x32xf32>
    %123 = arith.mulf %114, %50 : vector<1x32xf32>
    %124 = arith.mulf %108, %116 : vector<1x32xf32>
    %125 = arith.addf %123, %124 : vector<1x32xf32>
    %126 = math.tanh %125 : vector<1x32xf32>
    %127 = arith.mulf %122, %126 : vector<1x32xf32>
    %128 = vector.extract_strided_slice %102 {offsets = [0, 0], sizes = [1, 32], strides = [1, 1]} : vector<1x128xf32> to vector<1x32xf32>
    %129 = arith.negf %128 : vector<1x32xf32>
    %130 = math.exp %129 : vector<1x32xf32>
    %cst_45 = arith.constant 1.000000e+00 : f32
    %131 = vector.broadcast %cst_45 : f32 to vector<1x32xf32>
    %132 = arith.addf %131, %130 : vector<1x32xf32>
    %133 = arith.divf %131, %132 : vector<1x32xf32>
    %134 = vector.extract_strided_slice %102 {offsets = [0, 32], sizes = [1, 32], strides = [1, 1]} : vector<1x128xf32> to vector<1x32xf32>
    %135 = arith.negf %134 : vector<1x32xf32>
    %136 = math.exp %135 : vector<1x32xf32>
    %cst_46 = arith.constant 1.000000e+00 : f32
    %137 = vector.broadcast %cst_46 : f32 to vector<1x32xf32>
    %138 = arith.addf %137, %136 : vector<1x32xf32>
    %139 = arith.divf %137, %138 : vector<1x32xf32>
    %140 = vector.extract_strided_slice %102 {offsets = [0, 64], sizes = [1, 32], strides = [1, 1]} : vector<1x128xf32> to vector<1x32xf32>
    %141 = math.tanh %140 : vector<1x32xf32>
    %142 = vector.extract_strided_slice %102 {offsets = [0, 96], sizes = [1, 32], strides = [1, 1]} : vector<1x128xf32> to vector<1x32xf32>
    %143 = arith.negf %142 : vector<1x32xf32>
    %144 = math.exp %143 : vector<1x32xf32>
    %cst_47 = arith.constant 1.000000e+00 : f32
    %145 = vector.broadcast %cst_47 : f32 to vector<1x32xf32>
    %146 = arith.addf %145, %144 : vector<1x32xf32>
    %147 = arith.divf %145, %146 : vector<1x32xf32>
    %148 = arith.mulf %139, %75 : vector<1x32xf32>
    %149 = arith.mulf %133, %141 : vector<1x32xf32>
    %150 = arith.addf %148, %149 : vector<1x32xf32>
    %151 = math.tanh %150 : vector<1x32xf32>
    %152 = arith.mulf %147, %151 : vector<1x32xf32>
    %153 = arith.index_cast %c1_i32 : i32 to index
    %c0_48 = arith.constant 0 : index
    %c0_49 = arith.constant 0 : index
    %154 = vector.load %arg10[%153, %c0_48, %c0_49] : memref<4x1x32xf32, #tpu.memory_space<vmem>>, vector<1x1x32xf32>
    %155 = vector.shape_cast %154 : vector<1x1x32xf32> to vector<1x32xf32>
    %156 = vector.shape_cast %127 : vector<1x32xf32> to vector<1x1x32xf32>
    tpu.vector_store %arg10[%153, %c0_48, %c0_49], %156 {strides = array<i32>} : memref<4x1x32xf32, #tpu.memory_space<vmem>>, vector<1x1x32xf32>,
    %157 = arith.index_cast %86 : i32 to index
    %c0_50 = arith.constant 0 : index
    %c0_51 = arith.constant 0 : index
    %158 = vector.load %arg11[%157, %c0_50, %c0_51] : memref<4x1x32xf32, #tpu.memory_space<vmem>>, vector<1x1x32xf32>
    %159 = vector.shape_cast %158 : vector<1x1x32xf32> to vector<1x32xf32>
    %160 = vector.shape_cast %152 : vector<1x32xf32> to vector<1x1x32xf32>
    tpu.vector_store %arg11[%157, %c0_50, %c0_51], %160 {strides = array<i32>} : memref<4x1x32xf32, #tpu.memory_space<vmem>>, vector<1x1x32xf32>,
    %c2_i32 = arith.constant 2 : i32
    %c3_i32_52 = arith.constant 3 : i32
    %161 = arith.subi %c3_i32_52, %c2_i32 : i32
    %162 = arith.index_cast %c2_i32 : i32 to index
    %c0_53 = arith.constant 0 : index
    %c0_54 = arith.constant 0 : index
    %163 = vector.load %arg9[%162, %c0_53, %c0_54] : memref<4x1x256xf32, #tpu.memory_space<vmem>>, vector<1x1x256xf32>
    %164 = vector.shape_cast %163 : vector<1x1x256xf32> to vector<1x256xf32>
    %165 = arith.index_cast %161 : i32 to index
    %c0_55 = arith.constant 0 : index
    %c0_56 = arith.constant 0 : index
    %166 = vector.load %arg9[%165, %c0_55, %c0_56] : memref<4x1x256xf32, #tpu.memory_space<vmem>>, vector<1x1x256xf32>
    %167 = vector.shape_cast %166 : vector<1x1x256xf32> to vector<1x256xf32>
    %168 = vector.extract_strided_slice %164 {offsets = [0, 0], sizes = [1, 128], strides = [1, 1]} : vector<1x256xf32> to vector<1x128xf32>
    %169 = arith.truncf %127 : vector<1x32xf32> to vector<1x32xbf16>
    %c0_57 = arith.constant 0 : index
    %c0_58 = arith.constant 0 : index
    %170 = vector.load %arg3[%c0_57, %c0_58] : memref<32x128xbf16, #tpu.memory_space<vmem>>, vector<32x128xbf16>
    %cst_59 = arith.constant dense<0.000000e+00> : vector<1x128xf32>
    %171 = tpu.matmul %169, %170, %cst_59 {dimension_numbers = #tpu.dot_dimension_numbers<[1], [0], [0], [1], [0, 0, 1, 1], [], []>} : vector<1x32xbf16>, vector<32x128xbf16>, vector<1x128xf32> -> vector<1x128xf32>
    %172 = arith.addf %168, %171 : vector<1x128xf32>
    %173 = vector.extract_strided_slice %167 {offsets = [0, 128], sizes = [1, 128], strides = [1, 1]} : vector<1x256xf32> to vector<1x128xf32>
    %174 = arith.truncf %152 : vector<1x32xf32> to vector<1x32xbf16>
    %c0_60 = arith.constant 0 : index
    %c0_61 = arith.constant 0 : index
    %175 = vector.load %arg4[%c0_60, %c0_61] : memref<32x128xbf16, #tpu.memory_space<vmem>>, vector<32x128xbf16>
    %cst_62 = arith.constant dense<0.000000e+00> : vector<1x128xf32>
    %176 = tpu.matmul %174, %175, %cst_62 {dimension_numbers = #tpu.dot_dimension_numbers<[1], [0], [0], [1], [0, 0, 1, 1], [], []>} : vector<1x32xbf16>, vector<32x128xbf16>, vector<1x128xf32> -> vector<1x128xf32>
    %177 = arith.addf %173, %176 : vector<1x128xf32>
    %178 = vector.extract_strided_slice %172 {offsets = [0, 0], sizes = [1, 32], strides = [1, 1]} : vector<1x128xf32> to vector<1x32xf32>
    %179 = arith.negf %178 : vector<1x32xf32>
    %180 = math.exp %179 : vector<1x32xf32>
    %cst_63 = arith.constant 1.000000e+00 : f32
    %181 = vector.broadcast %cst_63 : f32 to vector<1x32xf32>
    %182 = arith.addf %181, %180 : vector<1x32xf32>
    %183 = arith.divf %181, %182 : vector<1x32xf32>
    %184 = vector.extract_strided_slice %172 {offsets = [0, 32], sizes = [1, 32], strides = [1, 1]} : vector<1x128xf32> to vector<1x32xf32>
    %185 = arith.negf %184 : vector<1x32xf32>
    %186 = math.exp %185 : vector<1x32xf32>
    %cst_64 = arith.constant 1.000000e+00 : f32
    %187 = vector.broadcast %cst_64 : f32 to vector<1x32xf32>
    %188 = arith.addf %187, %186 : vector<1x32xf32>
    %189 = arith.divf %187, %188 : vector<1x32xf32>
    %190 = vector.extract_strided_slice %172 {offsets = [0, 64], sizes = [1, 32], strides = [1, 1]} : vector<1x128xf32> to vector<1x32xf32>
    %191 = math.tanh %190 : vector<1x32xf32>
    %192 = vector.extract_strided_slice %172 {offsets = [0, 96], sizes = [1, 32], strides = [1, 1]} : vector<1x128xf32> to vector<1x32xf32>
    %193 = arith.negf %192 : vector<1x32xf32>
    %194 = math.exp %193 : vector<1x32xf32>
    %cst_65 = arith.constant 1.000000e+00 : f32
    %195 = vector.broadcast %cst_65 : f32 to vector<1x32xf32>
    %196 = arith.addf %195, %194 : vector<1x32xf32>
    %197 = arith.divf %195, %196 : vector<1x32xf32>
    %198 = arith.mulf %189, %125 : vector<1x32xf32>
    %199 = arith.mulf %183, %191 : vector<1x32xf32>
    %200 = arith.addf %198, %199 : vector<1x32xf32>
    %201 = math.tanh %200 : vector<1x32xf32>
    %202 = arith.mulf %197, %201 : vector<1x32xf32>
    %203 = vector.extract_strided_slice %177 {offsets = [0, 0], sizes = [1, 32], strides = [1, 1]} : vector<1x128xf32> to vector<1x32xf32>
    %204 = arith.negf %203 : vector<1x32xf32>
    %205 = math.exp %204 : vector<1x32xf32>
    %cst_66 = arith.constant 1.000000e+00 : f32
    %206 = vector.broadcast %cst_66 : f32 to vector<1x32xf32>
    %207 = arith.addf %206, %205 : vector<1x32xf32>
    %208 = arith.divf %206, %207 : vector<1x32xf32>
    %209 = vector.extract_strided_slice %177 {offsets = [0, 32], sizes = [1, 32], strides = [1, 1]} : vector<1x128xf32> to vector<1x32xf32>
    %210 = arith.negf %209 : vector<1x32xf32>
    %211 = math.exp %210 : vector<1x32xf32>
    %cst_67 = arith.constant 1.000000e+00 : f32
    %212 = vector.broadcast %cst_67 : f32 to vector<1x32xf32>
    %213 = arith.addf %212, %211 : vector<1x32xf32>
    %214 = arith.divf %212, %213 : vector<1x32xf32>
    %215 = vector.extract_strided_slice %177 {offsets = [0, 64], sizes = [1, 32], strides = [1, 1]} : vector<1x128xf32> to vector<1x32xf32>
    %216 = math.tanh %215 : vector<1x32xf32>
    %217 = vector.extract_strided_slice %177 {offsets = [0, 96], sizes = [1, 32], strides = [1, 1]} : vector<1x128xf32> to vector<1x32xf32>
    %218 = arith.negf %217 : vector<1x32xf32>
    %219 = math.exp %218 : vector<1x32xf32>
    %cst_68 = arith.constant 1.000000e+00 : f32
    %220 = vector.broadcast %cst_68 : f32 to vector<1x32xf32>
    %221 = arith.addf %220, %219 : vector<1x32xf32>
    %222 = arith.divf %220, %221 : vector<1x32xf32>
    %223 = arith.mulf %214, %150 : vector<1x32xf32>
    %224 = arith.mulf %208, %216 : vector<1x32xf32>
    %225 = arith.addf %223, %224 : vector<1x32xf32>
    %226 = math.tanh %225 : vector<1x32xf32>
    %227 = arith.mulf %222, %226 : vector<1x32xf32>
    %228 = arith.index_cast %c2_i32 : i32 to index
    %c0_69 = arith.constant 0 : index
    %c0_70 = arith.constant 0 : index
    %229 = vector.load %arg10[%228, %c0_69, %c0_70] : memref<4x1x32xf32, #tpu.memory_space<vmem>>, vector<1x1x32xf32>
    %230 = vector.shape_cast %229 : vector<1x1x32xf32> to vector<1x32xf32>
    %231 = vector.shape_cast %202 : vector<1x32xf32> to vector<1x1x32xf32>
    tpu.vector_store %arg10[%228, %c0_69, %c0_70], %231 {strides = array<i32>} : memref<4x1x32xf32, #tpu.memory_space<vmem>>, vector<1x1x32xf32>,
    %232 = arith.index_cast %161 : i32 to index
    %c0_71 = arith.constant 0 : index
    %c0_72 = arith.constant 0 : index
    %233 = vector.load %arg11[%232, %c0_71, %c0_72] : memref<4x1x32xf32, #tpu.memory_space<vmem>>, vector<1x1x32xf32>
    %234 = vector.shape_cast %233 : vector<1x1x32xf32> to vector<1x32xf32>
    %235 = vector.shape_cast %227 : vector<1x32xf32> to vector<1x1x32xf32>
    tpu.vector_store %arg11[%232, %c0_71, %c0_72], %235 {strides = array<i32>} : memref<4x1x32xf32, #tpu.memory_space<vmem>>, vector<1x1x32xf32>,
    %c3_i32_73 = arith.constant 3 : i32
    %c3_i32_74 = arith.constant 3 : i32
    %236 = arith.subi %c3_i32_74, %c3_i32_73 : i32
    %237 = arith.index_cast %c3_i32_73 : i32 to index
    %c0_75 = arith.constant 0 : index
    %c0_76 = arith.constant 0 : index
    %238 = vector.load %arg9[%237, %c0_75, %c0_76] : memref<4x1x256xf32, #tpu.memory_space<vmem>>, vector<1x1x256xf32>
    %239 = vector.shape_cast %238 : vector<1x1x256xf32> to vector<1x256xf32>
    %240 = arith.index_cast %236 : i32 to index
    %c0_77 = arith.constant 0 : index
    %c0_78 = arith.constant 0 : index
    %241 = vector.load %arg9[%240, %c0_77, %c0_78] : memref<4x1x256xf32, #tpu.memory_space<vmem>>, vector<1x1x256xf32>
    %242 = vector.shape_cast %241 : vector<1x1x256xf32> to vector<1x256xf32>
    %243 = vector.extract_strided_slice %239 {offsets = [0, 0], sizes = [1, 128], strides = [1, 1]} : vector<1x256xf32> to vector<1x128xf32>
    %244 = arith.truncf %202 : vector<1x32xf32> to vector<1x32xbf16>
    %c0_79 = arith.constant 0 : index
    %c0_80 = arith.constant 0 : index
    %245 = vector.load %arg3[%c0_79, %c0_80] : memref<32x128xbf16, #tpu.memory_space<vmem>>, vector<32x128xbf16>
    %cst_81 = arith.constant dense<0.000000e+00> : vector<1x128xf32>
    %246 = tpu.matmul %244, %245, %cst_81 {dimension_numbers = #tpu.dot_dimension_numbers<[1], [0], [0], [1], [0, 0, 1, 1], [], []>} : vector<1x32xbf16>, vector<32x128xbf16>, vector<1x128xf32> -> vector<1x128xf32>
    %247 = arith.addf %243, %246 : vector<1x128xf32>
    %248 = vector.extract_strided_slice %242 {offsets = [0, 128], sizes = [1, 128], strides = [1, 1]} : vector<1x256xf32> to vector<1x128xf32>
    %249 = arith.truncf %227 : vector<1x32xf32> to vector<1x32xbf16>
    %c0_82 = arith.constant 0 : index
    %c0_83 = arith.constant 0 : index
    %250 = vector.load %arg4[%c0_82, %c0_83] : memref<32x128xbf16, #tpu.memory_space<vmem>>, vector<32x128xbf16>
    %cst_84 = arith.constant dense<0.000000e+00> : vector<1x128xf32>
    %251 = tpu.matmul %249, %250, %cst_84 {dimension_numbers = #tpu.dot_dimension_numbers<[1], [0], [0], [1], [0, 0, 1, 1], [], []>} : vector<1x32xbf16>, vector<32x128xbf16>, vector<1x128xf32> -> vector<1x128xf32>
    %252 = arith.addf %248, %251 : vector<1x128xf32>
    %253 = vector.extract_strided_slice %247 {offsets = [0, 0], sizes = [1, 32], strides = [1, 1]} : vector<1x128xf32> to vector<1x32xf32>
    %254 = arith.negf %253 : vector<1x32xf32>
    %255 = math.exp %254 : vector<1x32xf32>
    %cst_85 = arith.constant 1.000000e+00 : f32
    %256 = vector.broadcast %cst_85 : f32 to vector<1x32xf32>
    %257 = arith.addf %256, %255 : vector<1x32xf32>
    %258 = arith.divf %256, %257 : vector<1x32xf32>
    %259 = vector.extract_strided_slice %247 {offsets = [0, 32], sizes = [1, 32], strides = [1, 1]} : vector<1x128xf32> to vector<1x32xf32>
    %260 = arith.negf %259 : vector<1x32xf32>
    %261 = math.exp %260 : vector<1x32xf32>
    %cst_86 = arith.constant 1.000000e+00 : f32
    %262 = vector.broadcast %cst_86 : f32 to vector<1x32xf32>
    %263 = arith.addf %262, %261 : vector<1x32xf32>
    %264 = arith.divf %262, %263 : vector<1x32xf32>
    %265 = vector.extract_strided_slice %247 {offsets = [0, 64], sizes = [1, 32], strides = [1, 1]} : vector<1x128xf32> to vector<1x32xf32>
    %266 = math.tanh %265 : vector<1x32xf32>
    %267 = vector.extract_strided_slice %247 {offsets = [0, 96], sizes = [1, 32], strides = [1, 1]} : vector<1x128xf32> to vector<1x32xf32>
    %268 = arith.negf %267 : vector<1x32xf32>
    %269 = math.exp %268 : vector<1x32xf32>
    %cst_87 = arith.constant 1.000000e+00 : f32
    %270 = vector.broadcast %cst_87 : f32 to vector<1x32xf32>
    %271 = arith.addf %270, %269 : vector<1x32xf32>
    %272 = arith.divf %270, %271 : vector<1x32xf32>
    %273 = arith.mulf %264, %200 : vector<1x32xf32>
    %274 = arith.mulf %258, %266 : vector<1x32xf32>
    %275 = arith.addf %273, %274 : vector<1x32xf32>
    %276 = math.tanh %275 : vector<1x32xf32>
    %277 = arith.mulf %272, %276 : vector<1x32xf32>
    %278 = vector.extract_strided_slice %252 {offsets = [0, 0], sizes = [1, 32], strides = [1, 1]} : vector<1x128xf32> to vector<1x32xf32>
    %279 = arith.negf %278 : vector<1x32xf32>
    %280 = math.exp %279 : vector<1x32xf32>
    %cst_88 = arith.constant 1.000000e+00 : f32
    %281 = vector.broadcast %cst_88 : f32 to vector<1x32xf32>
    %282 = arith.addf %281, %280 : vector<1x32xf32>
    %283 = arith.divf %281, %282 : vector<1x32xf32>
    %284 = vector.extract_strided_slice %252 {offsets = [0, 32], sizes = [1, 32], strides = [1, 1]} : vector<1x128xf32> to vector<1x32xf32>
    %285 = arith.negf %284 : vector<1x32xf32>
    %286 = math.exp %285 : vector<1x32xf32>
    %cst_89 = arith.constant 1.000000e+00 : f32
    %287 = vector.broadcast %cst_89 : f32 to vector<1x32xf32>
    %288 = arith.addf %287, %286 : vector<1x32xf32>
    %289 = arith.divf %287, %288 : vector<1x32xf32>
    %290 = vector.extract_strided_slice %252 {offsets = [0, 64], sizes = [1, 32], strides = [1, 1]} : vector<1x128xf32> to vector<1x32xf32>
    %291 = math.tanh %290 : vector<1x32xf32>
    %292 = vector.extract_strided_slice %252 {offsets = [0, 96], sizes = [1, 32], strides = [1, 1]} : vector<1x128xf32> to vector<1x32xf32>
    %293 = arith.negf %292 : vector<1x32xf32>
    %294 = math.exp %293 : vector<1x32xf32>
    %cst_90 = arith.constant 1.000000e+00 : f32
    %295 = vector.broadcast %cst_90 : f32 to vector<1x32xf32>
    %296 = arith.addf %295, %294 : vector<1x32xf32>
    %297 = arith.divf %295, %296 : vector<1x32xf32>
    %298 = arith.mulf %289, %225 : vector<1x32xf32>
    %299 = arith.mulf %283, %291 : vector<1x32xf32>
    %300 = arith.addf %298, %299 : vector<1x32xf32>
    %301 = math.tanh %300 : vector<1x32xf32>
    %302 = arith.mulf %297, %301 : vector<1x32xf32>
    %303 = arith.index_cast %c3_i32_73 : i32 to index
    %c0_91 = arith.constant 0 : index
    %c0_92 = arith.constant 0 : index
    %304 = vector.load %arg10[%303, %c0_91, %c0_92] : memref<4x1x32xf32, #tpu.memory_space<vmem>>, vector<1x1x32xf32>
    %305 = vector.shape_cast %304 : vector<1x1x32xf32> to vector<1x32xf32>
    %306 = vector.shape_cast %277 : vector<1x32xf32> to vector<1x1x32xf32>
    tpu.vector_store %arg10[%303, %c0_91, %c0_92], %306 {strides = array<i32>} : memref<4x1x32xf32, #tpu.memory_space<vmem>>, vector<1x1x32xf32>,
    %307 = arith.index_cast %236 : i32 to index
    %c0_93 = arith.constant 0 : index
    %c0_94 = arith.constant 0 : index
    %308 = vector.load %arg11[%307, %c0_93, %c0_94] : memref<4x1x32xf32, #tpu.memory_space<vmem>>, vector<1x1x32xf32>
    %309 = vector.shape_cast %308 : vector<1x1x32xf32> to vector<1x32xf32>
    %310 = vector.shape_cast %302 : vector<1x32xf32> to vector<1x1x32xf32>
    tpu.vector_store %arg11[%307, %c0_93, %c0_94], %310 {strides = array<i32>} : memref<4x1x32xf32, #tpu.memory_space<vmem>>, vector<1x1x32xf32>,
    %c4_i32 = arith.constant 4 : i32
    %c0_95 = arith.constant 0 : index
    %c0_96 = arith.constant 0 : index
    %c0_97 = arith.constant 0 : index
    %311 = vector.load %arg10[%c0_95, %c0_96, %c0_97] : memref<4x1x32xf32, #tpu.memory_space<vmem>>, vector<4x1x32xf32>
    %c0_98 = arith.constant 0 : index
    %c0_99 = arith.constant 0 : index
    %c0_100 = arith.constant 0 : index
    %312 = vector.load %arg11[%c0_98, %c0_99, %c0_100] : memref<4x1x32xf32, #tpu.memory_space<vmem>>, vector<4x1x32xf32>
    %313 = tpu.concatenate %311, %312 in 2 : vector<4x1x32xf32>, vector<4x1x32xf32> -> vector<4x1x64xf32>
    %c0_101 = arith.constant 0 : index
    %c0_102 = arith.constant 0 : index
    %c0_103 = arith.constant 0 : index
    %c0_104 = arith.constant 0 : index
    %314 = vector.load %arg6[%c0_101, %c0_102, %c0_103, %c0_104] : memref<1x4x1x64xf32, #tpu.memory_space<vmem>>, vector<1x4x1x64xf32>
    %315 = vector.shape_cast %314 : vector<1x4x1x64xf32> to vector<4x1x64xf32>
    %316 = vector.shape_cast %313 : vector<4x1x64xf32> to vector<1x4x1x64xf32>
    tpu.vector_store %arg6[%c0_101, %c0_102, %c0_103, %c0_104], %316 {strides = array<i32>} : memref<1x4x1x64xf32, #tpu.memory_space<vmem>>, vector<1x4x1x64xf32>,
    %c0_105 = arith.constant 0 : index
    %c0_106 = arith.constant 0 : index
    %c0_107 = arith.constant 0 : index
    %c0_108 = arith.constant 0 : index
    %317 = vector.load %arg7[%c0_105, %c0_106, %c0_107, %c0_108] : memref<1x2x1x32xf32, #tpu.memory_space<vmem>>, vector<1x1x1x32xf32>
    %318 = vector.shape_cast %317 : vector<1x1x1x32xf32> to vector<1x32xf32>
    %319 = vector.shape_cast %277 : vector<1x32xf32> to vector<1x1x1x32xf32>
    tpu.vector_store %arg7[%c0_105, %c0_106, %c0_107, %c0_108], %319 {strides = array<i32>} : memref<1x2x1x32xf32, #tpu.memory_space<vmem>>, vector<1x1x1x32xf32>,
    %c0_109 = arith.constant 0 : index
    %c1 = arith.constant 1 : index
    %c0_110 = arith.constant 0 : index
    %c0_111 = arith.constant 0 : index
    %320 = vector.load %arg7[%c0_109, %c1, %c0_110, %c0_111] : memref<1x2x1x32xf32, #tpu.memory_space<vmem>>, vector<1x1x1x32xf32>
    %321 = vector.shape_cast %320 : vector<1x1x1x32xf32> to vector<1x32xf32>
    %322 = vector.shape_cast %302 : vector<1x32xf32> to vector<1x1x1x32xf32>
    tpu.vector_store %arg7[%c0_109, %c1, %c0_110, %c0_111], %322 {strides = array<i32>} : memref<1x2x1x32xf32, #tpu.memory_space<vmem>>, vector<1x1x1x32xf32>,
    %c0_112 = arith.constant 0 : index
    %c0_113 = arith.constant 0 : index
    %c0_114 = arith.constant 0 : index
    %c0_115 = arith.constant 0 : index
    %323 = vector.load %arg8[%c0_112, %c0_113, %c0_114, %c0_115] : memref<1x2x1x32xf32, #tpu.memory_space<vmem>>, vector<1x1x1x32xf32>
    %324 = vector.shape_cast %323 : vector<1x1x1x32xf32> to vector<1x32xf32>
    %325 = vector.shape_cast %275 : vector<1x32xf32> to vector<1x1x1x32xf32>
    tpu.vector_store %arg8[%c0_112, %c0_113, %c0_114, %c0_115], %325 {strides = array<i32>} : memref<1x2x1x32xf32, #tpu.memory_space<vmem>>, vector<1x1x1x32xf32>,
    %c0_116 = arith.constant 0 : index
    %c1_117 = arith.constant 1 : index
    %c0_118 = arith.constant 0 : index
    %c0_119 = arith.constant 0 : index
    %326 = vector.load %arg8[%c0_116, %c1_117, %c0_118, %c0_119] : memref<1x2x1x32xf32, #tpu.memory_space<vmem>>, vector<1x1x1x32xf32>
    %327 = vector.shape_cast %326 : vector<1x1x1x32xf32> to vector<1x32xf32>
    %328 = vector.shape_cast %300 : vector<1x32xf32> to vector<1x1x1x32xf32>
    tpu.vector_store %arg8[%c0_116, %c1_117, %c0_118, %c0_119], %328 {strides = array<i32>} : memref<1x2x1x32xf32, #tpu.memory_space<vmem>>, vector<1x1x1x32xf32>,
    return
  }
  func.func @transform_0(%arg0: i32) -> (i32, i32, i32, i32) {
    %c0_i32 = arith.constant 0 : i32
    %c0_i32_0 = arith.constant 0 : i32
    %c0_i32_1 = arith.constant 0 : i32
    %c0_i32_2 = arith.constant 0 : i32
    return %arg0, %c0_i32, %c0_i32_0, %c0_i32_1 : i32, i32, i32, i32
  }
  func.func @transform_1(%arg0: i32) -> (i32, i32) {
    %c0_i32 = arith.constant 0 : i32
    %c0_i32_0 = arith.constant 0 : i32
    %c0_i32_1 = arith.constant 0 : i32
    return %c0_i32, %c0_i32_0 : i32, i32
  }
  func.func @transform_2(%arg0: i32) -> (i32, i32) {
    %c0_i32 = arith.constant 0 : i32
    %c0_i32_0 = arith.constant 0 : i32
    %c0_i32_1 = arith.constant 0 : i32
    return %c0_i32, %c0_i32_0 : i32, i32
  }
  func.func @transform_3(%arg0: i32) -> (i32, i32) {
    %c0_i32 = arith.constant 0 : i32
    %c0_i32_0 = arith.constant 0 : i32
    %c0_i32_1 = arith.constant 0 : i32
    return %c0_i32, %c0_i32_0 : i32, i32
  }
  func.func @transform_4(%arg0: i32) -> (i32, i32) {
    %c0_i32 = arith.constant 0 : i32
    %c0_i32_0 = arith.constant 0 : i32
    %c0_i32_1 = arith.constant 0 : i32
    return %c0_i32, %c0_i32_0 : i32, i32
  }
  func.func @transform_5(%arg0: i32) -> (i32, i32, i32, i32) {
    %c0_i32 = arith.constant 0 : i32
    %c0_i32_0 = arith.constant 0 : i32
    %c0_i32_1 = arith.constant 0 : i32
    %c0_i32_2 = arith.constant 0 : i32
    return %arg0, %c0_i32, %c0_i32_0, %c0_i32_1 : i32, i32, i32, i32
  }
  func.func @transform_6(%arg0: i32) -> (i32, i32, i32, i32) {
    %c0_i32 = arith.constant 0 : i32
    %c0_i32_0 = arith.constant 0 : i32
    %c0_i32_1 = arith.constant 0 : i32
    %c0_i32_2 = arith.constant 0 : i32
    return %arg0, %c0_i32, %c0_i32_0, %c0_i32_1 : i32, i32, i32, i32
  }
  func.func @transform_7(%arg0: i32) -> (i32, i32, i32, i32) {
    %c0_i32 = arith.constant 0 : i32
    %c0_i32_0 = arith.constant 0 : i32
    %c0_i32_1 = arith.constant 0 : i32
    %c0_i32_2 = arith.constant 0 : i32
    return %arg0, %c0_i32, %c0_i32_0, %c0_i32_1 : i32, i32, i32, i32
  }
}

</mosaic_0001>

<bundles_post_ra>
// kernel: tpu_custom_call.1
= control target key start
LH: loop header
LB: loop body
LE: loop exit
PB: predicated region body
PF: predicated region fallthrough
CT: control target
= control target key end

     0   :  { %s2597_s0 = inlined_call_operand.vmem [shape: bf16[2,4,1,32], index: 0, kind: input, shape index: {}]   ;;  %s2598_s1 = inlined_call_operand.hbm [shape: bf16[32,256], index: 1, kind: input, shape index: {}]   ;;  %s2599_s2 = inlined_call_operand.hbm [shape: bf16[32,128], index: 2, kind: input, shape index: {}]   ;;  %s2600_s3 = inlined_call_operand.vmem [shape: bf16[32,128], index: 3, kind: input, shape index: {}]   ;;  %s2601_s4 = inlined_call_operand.vmem [shape: f32[1,256], index: 4, kind: input, shape index: {}]   ;;  %s2602_s5 = inlined_call_operand.hbm [shape: f32[2,4,1,64], index: 5, kind: output, shape index: {0}]   ;;  %s2603_s6 = inlined_call_operand.hbm [shape: f32[2,2,1,32], index: 6, kind: output, shape index: {1}]   ;;  %s2604_s7 = inlined_call_operand.hbm [shape: f32[2,2,1,32], index: 7, kind: output, shape index: {2}]  }
   0x1   :  { %2613 = sst [smem:[#allocation18_spill]] %s2597_s0 }
   0x2   :  { %2614 = sst [smem:[#allocation19_spill]] %s2598_s1 }
   0x3   :  { %13 = vsyncpa [#allocation6], 0 }
   0x4   :  { %14 = vsyncpa [#allocation9], 0 }
   0x5   :  { %15 = vsyncpa [#allocation7], 0 }
   0x6   :  { %17 = vsyncpa [#allocation7 + $0x1], 0 }
   0x7   :  { %18 = vsyncpa [#allocation12], 0 }
   0x8   :  { %20 = vsyncpa [#allocation12 + $0x1], 0  ;;  %s2152_s24 = smov 0   ;;  %s2154_s25 = smov 0  }
   0x9   :  { %s2156_s26 = smov 0   ;;  %s2158_s27 = smov 0  }
   0xa LB: > { %s2173_s28 = sadd.s32 4294967295, %s2092_s27   ;;  %s2606_s29 = sadd.s32 4294967294, %s2092_s27   ;;  %s2092_s27 = sphi %s2158_s27, %s2635_s27   ;;  %s2088_s26 = sphi %s2156_s26, %s2634_s26   ;;  %s2084_s25 = sphi %s2154_s25, %s2633_s25   ;;  %s2080_s24 = sphi %s2152_s24, %s2632_s24  }
   0xb   : > { %s2177_s30 = sadd.s32 1, %s2092_s27   ;;  %s143_s8 = sadd.s32 1, %s2088_s26 }
   0xc   : > { %s140_s9 = ssub.s32 %s2092_s27, %s2177_s30  ;;  %p153_p0 = scmp.ne.s32.totalorder %s2088_s26, %s2084_s25 }
   0xd   : > { %p141_p1 = scmp.eq.s32.totalorder %s140_s9, 0  ;;  %p154_p2 = scmp.eq.s32.totalorder %s2173_s28, 1 }
   0xe   : > { %p159_p3 = scmp.ne.s32.totalorder %s2084_s25, %s2080_s24  ;;  %p160_p4 = scmp.eq.s32.totalorder %s2606_s29, 1 }
   0xf   : > { %s2190_s10 = scalar_select %p141_p1, %s2088_s26, %s143_s8  }
  0x10   : > { %p2192_p5 = por %p154_p2, %p153_p0  ;;  %p2196_p6 = por %p160_p4, %p159_p3 }
  0x11   : > { %p1589_p7 = scmp.ge.s32.totalorder %s2092_s27, 1  ;;  %p219_p8 = scmp.lt.s32.totalorder %s2092_s27, 3 }
  0x12   : > { %s2616_s12 = scalar_select %p2196_p6, 1, 0 }
  0x13   : > { %p2605_p9 = scmp.eq.s32.totalorder %s2173_s28, 0  ;;  %p2203_p10 = pnand %p1589_p7, %p219_p8 }
  0x14   : > { %s2094_s14 = smov [#allocation5]   ;;  %s2095_s17 = smov [#allocation8]  }
  0x15   : > { %s231_s15 = sshll.u32 %s2094_s14, 4  ;;  %p1761_p11 = pneg %p2203_p10  ;;  %s232_s15 = int_to_ptr.vmem [resolvable:$true] %s231_s15 }
  0x16   : > { %s244_s18 = sshll.u32 %s2095_s17, 4  ;;  %s1927_s19 = scalar_lea.vmem %s232_s15, 512  ;;  %s245_s18 = int_to_ptr.vmem [resolvable:$true] %s244_s18 }
  0x17   : > { %p2211_p12 = pnand %p2605_p9, %p1761_p11  ;;  %p1928_p0 = scmp.ne.s32.totalorder %s232_s15, %s1927_s19 }
  0x18   : > { %p1935_p3 = scmp.lt.s32.totalorder %s232_s15, %s232_s15  ;;  %p1936_p4 = scmp.lt.s32.totalorder %s1927_s19, %s1927_s19 }
  0x19   : > { %p1918_p13 = pneg %p2211_p12 }
  0x1a   : > { %p1937_p7 = por %p1936_p4, %p1935_p3 }
  0x1b   : > { %p1930_p1 = pnand %p1928_p0, %p1918_p13 }
  0x1d   : > { %p1931_p2 = pneg %p1930_p1 }
  0x1f   : > { %p1938_p8 = pnand %p1937_p7, %p1931_p2 }
  0x21   : > { %1941 = shalt.err (!%p1938_p8)
}
  0x22   : > { %s2096_s20 = smov 128   ;;  %s2097_s21 = smov 8  }
  0x23   : > { %s2619_s1 = sld [smem:[#allocation19_spill]]  ;;  %s1953_s8 = scalar_lea.vmem %s245_s18, 256 }
  0x24   : > { %p1954_p11 = scmp.ne.s32.totalorder %s245_s18, %s1953_s8  ;;  %p1961_p9 = scmp.lt.s32.totalorder %s245_s18, %s245_s18 }
  0x25   : > { %p1962_p6 = scmp.lt.s32.totalorder %s1953_s8, %s1953_s8 }
  0x26   : > { %p1956_p0 = pnand %p1954_p11, %p1918_p13 }
  0x27   : > { %p1963_p3 = por %p1962_p6, %p1961_p9 }
  0x28   : > { %p1957_p1 = pneg %p1956_p0 }
  0x29   : > { %1764 = dma.hbm_to_vmem [thread:$0]  (!%p2211_p12), %s2619_s1, 512, %s232_s15, [#allocation6], %s2096_s20, %s2096_s20, %s2097_s21  }
  0x2a   : > { %p1964_p2 = pnand %p1963_p3, %p1957_p1 }
  0x2c   : > { %1967 = shalt.err (!%p1964_p2)
}
  0x2d   : > { %s2098_s9 = smov 64   ;;  %s2099_s14 = smov 4  }
  0x2e   : > { %1767 = dma.hbm_to_vmem [thread:$0]  (!%p2211_p12), %s2599_s2, 256, %s245_s18, [#allocation9], %s2098_s9, %s2098_s9, %s2099_s14  }
  0x2f   : > { %273 = sbr.rel (%p2203_p10) target bundleno = 3023 (0xbcf), region = 40  ;;  %p2620_p4 = scmp.eq.s32.totalorder (!%p2203_p10), %s2173_s28, 0 }
  0x34   : > { %2063 = dma.done.wait (%p2620_p4), [#allocation6], 512   ;;  %p2621_p13 = pmov %p2620_p4 }
  0x35   : > { %p2622_p6 = pmov %p2620_p4 }
  0x36   : > { %2065 = vsyncadd (%p2621_p13), [#allocation6], 4294966784 }
  0x37   : > { %2067 = dma.done.wait (%p2622_p6), [#allocation9], 256   ;;  %p2623_p9 = pmov %p2620_p4 }
  0x38   : > { %p318_p7 = scmp.lt.s32.totalorder %s2173_s28, 1  ;;  %v333_v0 = vlaneseq  ;;  %v2100_v1 = vmov 0   ;;  %v2101_v2 = vmov 1966171168   ;;  %v2102_v4 = vmov 0.0   ;;  %s2624_s0 = sld [smem:[#allocation18_spill]] }
  0x39   : > { %2069 = vsyncadd (%p2623_p9), [#allocation9], 4294967040  ;;  %473 = vmatprep.mubr.bf16.mxu0 %v2100_v1  ;;  %v355_v3 = vunpack.c.l.s4 %v2101_v2  ;;  %1683 = vmatprep.subr.bf16.mxu1 %v2102_v4  ;;  %vm2103_vm0 = vmmov 0   ;;  %v1830_v7 = vld [vmem:[#allocation5 + $0x14] ss:$8 sps:$4 sm:$0xff]   ;;  %v1836_v15 = vld [vmem:[#allocation8 + $0x8] sm:$0xff]  }
  0x3a   : > { %s319_s13 = scalar_select %p318_p7, %s2173_s28, 1  ;;  %1687 = vmatprep.mubr.msk.bf16.mxu1 %vm2103_vm0, %v2102_v4  ;;  %v334_v5 = vshrl.u32 %v333_v0, 7  ;;  %v1832_v8 = vld [vmem:[#allocation5 + $0x10] ss:$8 sps:$4 sm:$0xff]   ;;  %453 = vmatprep.subr.bf16.mxu0 %v1830_v7  ;;  %v1833_v10 = vld [vmem:[#allocation5 + $0x4] ss:$8 sps:$4 sm:$0xff]  }
  0x3b   : > { %v356_v6 = vunpack.c.0.s8 %v355_v3  ;;  %v1835_v11 = vld [vmem:[#allocation5] ss:$8 sps:$4 sm:$0xff]   ;;  %454 = vmatpush1.bf16.msra.mxu0 %v1832_v8  ;;  %1684 = vmatpush3.bf16.msra.mxu1 %v1836_v15  ;;  %vm408_vm1 = vcmask 1041409   ;;  %vm411_vm2 = vcmask 1042434   ;;  %vm414_vm3 = vcmask 1043459   ;;  %v1837_v30 = vld [vmem:[%s2600_s3 + $0x8] sm:$0xff]  }
  0x3c   : > { %s1599_s15 = sshll.u32 %s319_s13, 2  ;;  %455 = vmatprep.subr.bf16.mxu0 %v1833_v10  ;;  %1685 = vmatprep.subr.bf16.mxu1 %v2102_v4  ;;  %v1838_v23 = vld [vmem:[#allocation8] sm:$0xff]   ;;  %vm437_vm4 = vcmask 261120   ;;  %v1839_v34 = vld [vmem:[%s2600_s3] sm:$0xff]   ;;  %v2276_v35 = vsub.s32 0, %v334_v5  ;;  %v339_v36 = vsub.s32 1, %v334_v5 }
  0x3d   : > { %v2252_v9 = vsub.s32 %v356_v6, %v334_v5  ;;  %v331_v37 = vld [vmem:[%s2601_s4] sm:$0x3]  ;;  %vm515_vm5 = vcmp.lt.s32.totalorder %v333_v0, 256  ;;  %s2104_s17 = smov 64   ;;  %s2105_s19 = smov 32   ;;  %vm700_vm6 = vcmask 253952  }
  0x3e   : > { %s321_s20 = scalar_lea.vmem %s2624_s0, %s1599_s15  ;;  %v336_v39 = vrot.slane %v331_v37, %v2276_v35  ;;  %v340_v40 = vrot.slane %v331_v37, %v339_v36  ;;  %s2442_s15 = sand.u32 1, %s2084_s25  }
  0x3f   : > { %v1600_v12 = vld.sshfl [vmem:[%s321_s20] sm:$0x1 pattern:$0x75316420]  ;;  %456 = vmatpush1.bf16.msra.mxu0 %v1835_v11  ;;  %1686 = vmatpush3.bf16.msra.mxu1 %v1838_v23  ;;  %v1840_v23 = vld [vmem:[%s2600_s3 + $0x8] sm:$0xff]   ;;  %s2608_s16 = sshll.u32 %s2442_s15, 1 }
  0x40   : > { %v1601_v13 = vld.sshfl [vmem:[%s321_s20 + $0x1] sm:$0x1 pattern:$0x75316420]  ;;  %v360_v14 = vrot.slane %v1600_v12, %v2252_v9  ;;  %1691 = vmatprep.subr.bf16.mxu0 %v2102_v4  ;;  %1699 = vmatprep.subr.bf16.mxu1 %v2102_v4  ;;  %s310_s18 = scalar_lea.vmem [#allocation11], %s2608_s16  ;;  %s1392_s21 = sand.u32 1, %s2173_s28  }
  0x41   : > { %v1602_v16 = vld.sshfl [vmem:[%s321_s20 + $0x2] sm:$0x1 pattern:$0x75316420]  ;;  %v374_v17 = vrot.slane %v1601_v13, %v2252_v9  ;;  %s2607_s22 = sshll.u32 %s2173_s28, 5  ;;  %s2465_s13 = scalar_lea.sflag [#allocation12], %s1392_s21 }
  0x42   : > { %v1603_v18 = vld.sshfl [vmem:[%s321_s20 + $0x3] sm:$0x1 pattern:$0x75316420]  ;;  %v388_v19 = vrot.slane %v1602_v16, %v2252_v9  ;;  %v403_v21 = vunpack.c.l.b16 %v360_v14  ;;  %1688 = vmatmul.mubr.bf16.vlgmr.msra.gmra.mxu1 %v2100_v1  ;;  %s1427_s20 = sshll.u32 %s310_s18, 4  ;;  %s2459_s9 = scalar_lea.hbm %s2603_s6, %s2607_s22  ;;  %s2451_s20 = int_to_ptr.vmem [resolvable:$true] %s1427_s20 }
  0x43   : > { %v402_v20 = vrot.slane %v1603_v18, %v2252_v9  ;;  %v404_v22 = vunpack.c.l.b16 %v374_v17  ;;  %1703 = vmatprep.mubr.msk.bf16.mxu1 %vm2103_vm0, %v2102_v4  ;;  %s1968_s29 = scalar_lea.vmem %s2451_s20, 32  ;;  %s2107_s23 = smov [#allocation11]  }
  0x44   : > { %v405_v24 = vunpack.c.l.b16 %v388_v19  ;;  %p1969_p10 = scmp.ne.s32.totalorder %s2451_s20, %s1968_s29  ;;  %s1972_s8 = sshll.u32 %s2107_s23, 4  ;;  %s1973_s8 = int_to_ptr.vmem [resolvable:$false] %s1972_s8 }
  0x45   : > { %v406_v25 = vunpack.c.l.b16 %v402_v20  ;;  %v407_v26 = vrot.slane %v404_v22, 7  ;;  %s1974_s22 = scalar_lea.vmem %s1973_s8, 64  ;;  %p1975_p11 = scmp.lt.s32.totalorder %s2451_s20, %s1973_s8 }
  0x46   : > { %v410_v27 = vrot.slane %v405_v24, 6  ;;  %v1842_v24 = vld [vmem:[#allocation8 + $0x8] sm:$0xff]   ;;  %p1970_p12 = pnand %p1969_p10, %p2192_p5  ;;  %p1976_p0 = scmp.lt.s32.totalorder %s1974_s22, %s1968_s29 }
  0x47   : > { %v409_v28 = vsel %vm408_vm1, %v407_v26, %v403_v21  ;;  %v413_v29 = vrot.slane %v406_v25, 5  ;;  %v1841_v25 = vld [vmem:[%s2600_s3] sm:$0xff]   ;;  %1700 = vmatpush3.bf16.msra.mxu1 %v1842_v24 }
  0x48   : > { %v412_v31 = vsel %vm411_vm2, %v410_v27, %v409_v28  ;;  %1701 = vmatprep.subr.bf16.mxu1 %v2102_v4  ;;  %v1843_v28 = vld [vmem:[#allocation8] sm:$0xff]   ;;  %p1971_p8 = pneg %p1970_p12  ;;  %p1977_p1 = por %p1976_p0, %p1975_p11 }
  0x49   : > { %v415_v32 = vsel %vm414_vm3, %v413_v29, %v412_v31 }
  0x4a   : > { %v416_v33 = vpack.c.b16 %v415_v32, %v415_v32  ;;  %p1978_p3 = pnand %p1977_p1, %p1971_p8 }
  0x4b   : > { %1702 = vmatpush3.bf16.msra.mxu1 %v1843_v28 }
  0x4c   : > { %1608 = vmatmul.mubr.msk.bf16.vlgmr.msra.gmra.mxu0 %vm437_vm4, %v416_v33  ;;  %1715 = vmatprep.subr.bf16.mxu1 %v2102_v4 }
  0x4d   : > { %1692 = vmatpush3.bf16.msra.mxu0 %v1837_v30  ;;  %1695 = vmatprep.mubr.msk.bf16.mxu0 %vm2103_vm0, %v2102_v4 }
  0x4e   : > { %1693 = vmatprep.subr.bf16.mxu0 %v2102_v4 }
  0x51   : > { %1694 = vmatpush3.bf16.msra.mxu0 %v1839_v34 }
  0x52   : > { %1707 = vmatprep.subr.bf16.mxu0 %v2102_v4 }
  0x54   : > { %1696 = vmatmul.mubr.bf16.vlgmr.msra.gmra.mxu0 %v2100_v1 }
  0x55   : > { %1711 = vmatprep.mubr.msk.bf16.mxu0 %vm2103_vm0, %v2102_v4  ;;  %1708 = vmatpush3.bf16.msra.mxu0 %v1840_v23 }
  0x56   : > { %1709 = vmatprep.subr.bf16.mxu0 %v2102_v4 }
  0x59   : > { %1710 = vmatpush3.bf16.msra.mxu0 %v1841_v25 }
  0x5a   : > { %1723 = vmatprep.subr.bf16.mxu0 %v2102_v4 }
 0x102   : > { %v577_v38 = vpop.f32.mrf.mxu1 }
 0x104   : > { %v1689_v41 = vpop.f32.mrf.mxu1 }
 0x106   : > { %v580_v43 = vpop.f32.mrf.mxu1 }
 0x108   : > { %v1690_v47 = vpop.f32.mrf.mxu1 }
 0x10c   : > { %v475_v42 = vpop.f32.mrf.mxu0 }
 0x10d   : > { %v476_v45 = vadd.f32 %v475_v42, %v336_v39 }
 0x10e   : > { %v477_v44 = vpop.f32.mrf.mxu0 }
 0x10f   : > { %v478_v46 = vadd.f32 %v477_v44, %v340_v40 }
 0x110   : > { %v479_v48 = vpop.f32.mrf.mxu0 }
 0x111   : > { %v484_v49 = vcombine.low %v476_v45, %v478_v46 }
 0x112   : > { %v480_v50 = vpop.f32.mrf.mxu0 }
 0x113   : > { %v491_v51 = vrot.slane %v484_v49, %v2252_v9 }
 0x114   : > { %v634_v52 = vpop.f32.mrf.mxu0 }
 0x115   : > { %v492_v53 = vcombine.high %v491_v51, %v491_v51  ;;  %v499_v54 = vrot.slane %v491_v51, %v2252_v9 }
 0x116   : > { %v1697_v55 = vpop.f32.mrf.mxu0 }
 0x117   : > { %v506_v56 = vrot.slane %v492_v53, %v2252_v9  ;;  %v507_v57 = vcombine.high %v499_v54, %v499_v54  ;;  %517 = vst.msk [vmem:[#allocation2] sm:$0x3] %vm515_vm5, %v499_v54 }
 0x118   : > { %v637_v58 = vpop.f32.mrf.mxu0 }
 0x119   : > { %v508_v59 = vcombine.high %v506_v56, %v506_v56  ;;  %518 = vst.msk [vmem:[#allocation2 + $0x2] sm:$0x3] %vm515_vm5, %v506_v56  ;;  %519 = vst.msk [vmem:[#allocation2 + $0x4] sm:$0x3] %vm515_vm5, %v507_v57 }
 0x11a   : > { %v1698_v60 = vpop.f32.mrf.mxu0 }
 0x11b   : > { %520 = vst.msk [vmem:[#allocation2 + $0x6] sm:$0x3] %vm515_vm5, %v508_v59 }
 0x11e   : > { %v521_v63 = vld [vmem:[#allocation2] sm:$0x3] }
 0x11f   : > { %v583_v0 = vadd.f32 %v577_v38, %v521_v63 }
 0x120   : > { %v715_v38 = vld [vmem:[#allocation2 + $0x4] sm:$0x3]  ;;  %v713_v43 = vld [vmem:[#allocation2 + $0x2] sm:$0x3] }
 0x121   : > { %v1613_v6 = vmul.f32 -1.442695, %v583_v0  ;;  %v844_v39 = vrot.slane %v715_v38, 1 }
 0x122   : > { %v523_v61 = vld [vmem:[#allocation2 + $0x6] sm:$0x3] }
 0x123   : > { %v641_v62 = vrot.slane %v523_v61, 1 }
 0x125   : > { %v643_v1 = vadd.f32 %v641_v62, %v634_v52 }
 0x127   : > { %1852 = vtanh.f32 %v643_v1  ;;  %v1614_v5 = vmul.f32 -1.442695, %v643_v1 }
 0x128   : > { %1854 = vtanh.f32 %v583_v0 }
 0x129   : > { %1856 = vpow2.f32 %v1614_v5 }
 0x12a   : > { %1858 = vpow2.f32 %v1613_v6 }
 0x134   : > { %v1853_v2 = vpop.eup %1852 }
 0x135   : > { %677 = vrot.lane.b32.xlu0 %v1853_v2, %s2104_s17  ;;  %v1855_v3 = vpop.eup %1854 }
 0x136   : > { %v1857_v7 = vpop.eup %1856 }
 0x137   : > { %v671_v8 = vadd.f32 1.0, %v1857_v7  ;;  %v1859_v9 = vpop.eup %1858 }
 0x138   : > { %v647_v10 = vadd.f32 1.0, %v1859_v9  ;;  %v1846_v9 = vld [vmem:[#allocation8 + $0x8] sm:$0xff]  }
 0x139   : > { %653 = vrot.lane.b32.xlu0 %v1855_v3, %s2104_s17  ;;  %1860 = vrcp.f32 %v671_v8  ;;  %v1844_v8 = vld [vmem:[%s2600_s3 + $0x8] sm:$0xff]  }
 0x13a   : > { %1862 = vrcp.f32 %v647_v10  ;;  %v1845_v10 = vld [vmem:[%s2600_s3] sm:$0xff]  }
 0x146   : > { %v1861_v11 = vpop.eup %1860 }
 0x147   : > { %v1863_v14 = vpop.eup %1862  ;;  %v675_v17 = vmul.f32 0.0, %v1861_v11 }
 0x148   : > { %v651_v20 = vmul.f32 0.0, %v1863_v14 }
 0x1a7   : > { %v678_v12 = vpop.permute.xlu0 %677 }
 0x1a8   : > { %v680_v13 = vmul.f32 %v1861_v11, %v678_v12 }
 0x1aa   : > { %682 = vrot.lane.b32.xlu1 %v680_v13, %s2105_s19  ;;  %v1847_v13 = vld [vmem:[#allocation8] sm:$0xff]  }
 0x1ab   : > { %v654_v15 = vpop.permute.xlu0 %653 }
 0x1ac   : > { %v656_v16 = vmul.f32 %v1863_v14, %v654_v15 }
 0x1ae   : > { %658 = vrot.lane.b32.xlu1 %v656_v16, %s2105_s19 }
 0x21c   : > { %v683_v18 = vpop.permute.xlu1 %682 }
 0x21d   : > { %v2290_v19 = vadd.f32 %v683_v18, %v675_v17 }
 0x21f   : > { %1864 = vtanh.f32 %v2290_v19 }
 0x220   : > { %v659_v21 = vpop.permute.xlu1 %658 }
 0x221   : > { %v2293_v22 = vadd.f32 %v659_v21, %v651_v20 }
 0x223   : > { %1866 = vtanh.f32 %v2293_v22 }
 0x22c   : > { %v1865_v26 = vpop.eup %1864 }
 0x22d   : > { %688 = vrot.lane.b32.xlu0 %v1865_v26, %s2104_s17 }
 0x230   : > { %v1867_v27 = vpop.eup %1866 }
 0x231   : > { %664 = vrot.lane.b32.xlu1 %v1867_v27, %s2104_s17  ;;  %v915_v27 = vld [vmem:[#allocation2 + $0x4] sm:$0x3] }
 0x29f   : > { %v689_v29 = vpop.permute.xlu0 %688 }
 0x2a0   : > { %v2308_v30 = vmul.f32 %v1861_v11, %v689_v29 }
 0x2a2   : > { %v780_v31 = vpack.c.bf16 %v2308_v30, %v2308_v30 }
 0x2a3   : > { %v665_v32 = vpop.permute.xlu1 %664 }
 0x2a4   : > { %v2312_v33 = vmul.f32 %v1863_v14, %v665_v32  ;;  %786 = vrot.lane.b32.xlu0 %v780_v31, %s2105_s19 }
 0x2a6   : > { %v716_v34 = vpack.c.bf16 %v2312_v33, %v2312_v33 }
 0x2a8   : > { %722 = vrot.lane.b32.xlu1 %v716_v34, %s2105_s19 }
 0x316   : > { %v787_v36 = vpop.permute.xlu0 %786 }
 0x317   : > { %1712 = vmatmul.mubr.msk.bf16.vlgmr.msra.gmra.mxu0 %vm437_vm4, %v787_v36 }
 0x318   : > { %1727 = vmatprep.mubr.msk.bf16.mxu0 %vm2103_vm0, %v2102_v4  ;;  %1724 = vmatpush3.bf16.msra.mxu0 %v1844_v8  ;;  %v1117_v8 = vld [vmem:[#allocation2] sm:$0x3] }
 0x319   : > { %1725 = vmatprep.subr.bf16.mxu0 %v2102_v4 }
 0x31a   : > { %v723_v37 = vpop.permute.xlu1 %722 }
 0x31b   : > { %1704 = vmatmul.mubr.msk.bf16.vlgmr.msra.gmra.mxu1 %vm437_vm4, %v723_v37 }
 0x31c   : > { %1719 = vmatprep.mubr.msk.bf16.mxu1 %vm2103_vm0, %v2102_v4  ;;  %1716 = vmatpush3.bf16.msra.mxu1 %v1846_v9  ;;  %v1246_v9 = vrot.slane %v1117_v8, 1 }
 0x31d   : > { %1717 = vmatprep.subr.bf16.mxu1 %v2102_v4  ;;  %1726 = vmatpush3.bf16.msra.mxu0 %v1845_v10 }
 0x31e   : > { %1739 = vmatprep.subr.bf16.mxu0 %v2102_v4 }
 0x320   : > { %1718 = vmatpush3.bf16.msra.mxu1 %v1847_v13  ;;  %v1116_v13 = vld [vmem:[#allocation2 + $0x6] sm:$0x3] }
 0x321   : > { %1731 = vmatprep.subr.bf16.mxu1 %v2102_v4 }
 0x3d7   : > { %v837_v40 = vpop.f32.mrf.mxu0 }
 0x3d8   : > { %v846_v41 = vadd.f32 %v844_v39, %v837_v40 }
 0x3d9   : > { %v1713_v42 = vpop.f32.mrf.mxu0 }
 0x3da   : > { %1868 = vtanh.f32 %v846_v41  ;;  %v1622_v53 = vmul.f32 -1.442695, %v846_v41 }
 0x3db   : > { %v773_v44 = vpop.f32.mrf.mxu1  ;;  %v840_v45 = vpop.f32.mrf.mxu0 }
 0x3dc   : > { %v779_v46 = vadd.f32 %v773_v44, %v713_v43 }
 0x3dd   : > { %v1705_v47 = vpop.f32.mrf.mxu1  ;;  %v1714_v48 = vpop.f32.mrf.mxu0 }
 0x3de   : > { %1870 = vtanh.f32 %v779_v46  ;;  %v1621_v54 = vmul.f32 -1.442695, %v779_v46 }
 0x3df   : > { %v776_v49 = vpop.f32.mrf.mxu1  ;;  %1872 = vpow2.f32 %v1622_v53 }
 0x3e0   : > { %1874 = vpow2.f32 %v1621_v54 }
 0x3e1   : > { %v1706_v50 = vpop.f32.mrf.mxu1 }
 0x3e7   : > { %v1869_v51 = vpop.eup %1868 }
 0x3e8   : > { %880 = vrot.lane.b32.xlu0 %v1869_v51, %s2104_s17 }
 0x3eb   : > { %v1871_v52 = vpop.eup %1870 }
 0x3ec   : > { %856 = vrot.lane.b32.xlu1 %v1871_v52, %s2104_s17  ;;  %v1873_v55 = vpop.eup %1872 }
 0x3ed   : > { %v874_v56 = vadd.f32 1.0, %v1873_v55  ;;  %v1875_v57 = vpop.eup %1874 }
 0x3ee   : > { %v850_v58 = vadd.f32 1.0, %v1875_v57 }
 0x3ef   : > { %1876 = vrcp.f32 %v874_v56 }
 0x3f0   : > { %1878 = vrcp.f32 %v850_v58  ;;  %v1848_v58 = vld [vmem:[%s2600_s3 + $0x8] sm:$0xff]  }
 0x3fc   : > { %v1877_v59 = vpop.eup %1876 }
 0x3fd   : > { %v1879_v62 = vpop.eup %1878  ;;  %v878_v0 = vmul.f32 %v1877_v59, %v2290_v19 }
 0x3fe   : > { %v854_v5 = vmul.f32 %v1879_v62, %v2293_v22  ;;  %v916_v22 = vld [vmem:[#allocation2 + $0x2] sm:$0x3] }
 0x3ff   : > { %v1045_v23 = vrot.slane %v916_v22, 1 }
 0x45a   : > { %v881_v60 = vpop.permute.xlu0 %880 }
 0x45b   : > { %v883_v61 = vmul.f32 %v1877_v59, %v881_v60  ;;  %v1849_v60 = vld [vmem:[%s2600_s3] sm:$0xff]  }
 0x45d   : > { %885 = vrot.lane.b32.xlu0 %v883_v61, %s2105_s19 }
 0x45e   : > { %v857_v63 = vpop.permute.xlu1 %856 }
 0x45f   : > { %v859_v1 = vmul.f32 %v1879_v62, %v857_v63  ;;  %v1851_v63 = vld [vmem:[#allocation8] sm:$0xff]  }
 0x461   : > { %861 = vrot.lane.b32.xlu1 %v859_v1, %s2105_s19 }
 0x4cf   : > { %v886_v2 = vpop.permute.xlu0 %885 }
 0x4d0   : > { %v2329_v3 = vadd.f32 %v886_v2, %v878_v0 }
 0x4d2   : > { %1880 = vtanh.f32 %v2329_v3 }
 0x4d3   : > { %v862_v6 = vpop.permute.xlu1 %861 }
 0x4d4   : > { %v2333_v7 = vadd.f32 %v862_v6, %v854_v5 }
 0x4d6   : > { %1882 = vtanh.f32 %v2333_v7 }
 0x4df   : > { %v1881_v11 = vpop.eup %1880 }
 0x4e0   : > { %891 = vrot.lane.b32.xlu0 %v1881_v11, %s2104_s17 }
 0x4e3   : > { %v1883_v12 = vpop.eup %1882 }
 0x4e4   : > { %867 = vrot.lane.b32.xlu1 %v1883_v12, %s2104_s17 }
 0x552   : > { %v892_v14 = vpop.permute.xlu0 %891 }
 0x553   : > { %v2348_v15 = vmul.f32 %v1877_v59, %v892_v14  ;;  %v1850_v59 = vld [vmem:[#allocation8 + $0x8] sm:$0xff]  }
 0x555   : > { %v981_v16 = vpack.c.bf16 %v2348_v15, %v2348_v15 }
 0x556   : > { %v868_v17 = vpop.permute.xlu1 %867 }
 0x557   : > { %v2352_v18 = vmul.f32 %v1879_v62, %v868_v17  ;;  %987 = vrot.lane.b32.xlu0 %v981_v16, %s2105_s19 }
 0x559   : > { %v917_v19 = vpack.c.bf16 %v2352_v18, %v2352_v18 }
 0x55b   : > { %923 = vrot.lane.b32.xlu1 %v917_v19, %s2105_s19 }
 0x5c9   : > { %v988_v20 = vpop.permute.xlu0 %987 }
 0x5ca   : > { %1728 = vmatmul.mubr.msk.bf16.vlgmr.msra.gmra.mxu0 %vm437_vm4, %v988_v20 }
 0x5cb   : > { %1743 = vmatprep.mubr.msk.bf16.mxu0 %vm2103_vm0, %v2102_v4  ;;  %1740 = vmatpush3.bf16.msra.mxu0 %v1848_v58 }
 0x5cc   : > { %1741 = vmatprep.subr.bf16.mxu0 %v2102_v4 }
 0x5cd   : > { %v924_v21 = vpop.permute.xlu1 %923 }
 0x5ce   : > { %1720 = vmatmul.mubr.msk.bf16.vlgmr.msra.gmra.mxu1 %vm437_vm4, %v924_v21 }
 0x5cf   : > { %1735 = vmatprep.mubr.msk.bf16.mxu1 %vm2103_vm0, %v2102_v4  ;;  %1732 = vmatpush3.bf16.msra.mxu1 %v1850_v59 }
 0x5d0   : > { %1733 = vmatprep.subr.bf16.mxu1 %v2102_v4  ;;  %1742 = vmatpush3.bf16.msra.mxu0 %v1849_v60 }
 0x5d3   : > { %1734 = vmatpush3.bf16.msra.mxu1 %v1851_v63 }
 0x68a   : > { %v1038_v24 = vpop.f32.mrf.mxu0 }
 0x68b   : > { %v1047_v25 = vadd.f32 %v1045_v23, %v1038_v24 }
 0x68c   : > { %v1729_v26 = vpop.f32.mrf.mxu0 }
 0x68d   : > { %1884 = vtanh.f32 %v1047_v25  ;;  %v1630_v40 = vmul.f32 -1.442695, %v1047_v25 }
 0x68e   : > { %v974_v28 = vpop.f32.mrf.mxu1  ;;  %v1041_v29 = vpop.f32.mrf.mxu0 }
 0x68f   : > { %v980_v31 = vadd.f32 %v974_v28, %v915_v27 }
 0x690   : > { %v1721_v32 = vpop.f32.mrf.mxu1  ;;  %v1730_v34 = vpop.f32.mrf.mxu0 }
 0x691   : > { %1886 = vtanh.f32 %v980_v31  ;;  %v1629_v41 = vmul.f32 -1.442695, %v980_v31 }
 0x692   : > { %v977_v36 = vpop.f32.mrf.mxu1  ;;  %1888 = vpow2.f32 %v1630_v40 }
 0x693   : > { %1890 = vpow2.f32 %v1629_v41 }
 0x694   : > { %v1722_v37 = vpop.f32.mrf.mxu1 }
 0x69a   : > { %v1885_v38 = vpop.eup %1884 }
 0x69b   : > { %1081 = vrot.lane.b32.xlu0 %v1885_v38, %s2104_s17 }
 0x69e   : > { %v1887_v39 = vpop.eup %1886 }
 0x69f   : > { %1057 = vrot.lane.b32.xlu1 %v1887_v39, %s2104_s17  ;;  %v1889_v42 = vpop.eup %1888 }
 0x6a0   : > { %v1075_v43 = vadd.f32 1.0, %v1889_v42  ;;  %v1891_v44 = vpop.eup %1890 }
 0x6a1   : > { %v1051_v45 = vadd.f32 1.0, %v1891_v44 }
 0x6a2   : > { %1892 = vrcp.f32 %v1075_v43 }
 0x6a3   : > { %1894 = vrcp.f32 %v1051_v45 }
 0x6af   : > { %v1893_v46 = vpop.eup %1892 }
 0x6b0   : > { %v1895_v49 = vpop.eup %1894  ;;  %v1079_v52 = vmul.f32 %v1893_v46, %v2329_v3 }
 0x6b1   : > { %v1055_v55 = vmul.f32 %v1895_v49, %v2333_v7 }
 0x70d   : > { %v1082_v47 = vpop.permute.xlu0 %1081 }
 0x70e   : > { %v1084_v48 = vmul.f32 %v1893_v46, %v1082_v47  ;;  %v706_v47 = vrot.slane %v2308_v30, %v2276_v35 }
 0x710   : > { %1086 = vrot.lane.b32.xlu0 %v1084_v48, %s2105_s19 }
 0x711   : > { %v1058_v50 = vpop.permute.xlu1 %1057 }
 0x712   : > { %v1060_v51 = vmul.f32 %v1895_v49, %v1058_v50 }
 0x714   : > { %1062 = vrot.lane.b32.xlu1 %v1060_v51, %s2105_s19  ;;  %v696_v51 = vrot.slane %v2312_v33, %v2276_v35  ;;  %v899_v33 = vrot.slane %v2352_v18, %v2276_v35 }
 0x782   : > { %v1087_v53 = vpop.permute.xlu0 %1086 }
 0x783   : > { %v2369_v54 = vadd.f32 %v1087_v53, %v1079_v52 }
 0x785   : > { %1896 = vtanh.f32 %v2369_v54 }
 0x786   : > { %v1063_v56 = vpop.permute.xlu1 %1062 }
 0x787   : > { %v2373_v57 = vadd.f32 %v1063_v56, %v1055_v55 }
 0x789   : > { %1898 = vtanh.f32 %v2373_v57 }
 0x792   : > { %v1897_v61 = vpop.eup %1896 }
 0x793   : > { %1092 = vrot.lane.b32.xlu0 %v1897_v61, %s2104_s17 }
 0x796   : > { %v1899_v62 = vpop.eup %1898 }
 0x797   : > { %1068 = vrot.lane.b32.xlu1 %v1899_v62, %s2104_s17 }
 0x805   : > { %v1093_v1 = vpop.permute.xlu0 %1092 }
 0x806   : > { %v2386_v0 = vmul.f32 %v1893_v46, %v1093_v1 }
 0x808   : > { %v1182_v2 = vpack.c.bf16 %v2386_v0, %v2386_v0  ;;  %v1110_v50 = vrot.slane %v2386_v0, %v2276_v35 }
 0x809   : > { %v1069_v3 = vpop.permute.xlu1 %1068 }
 0x80a   : > { %v2390_v5 = vmul.f32 %v1895_v49, %v1069_v3  ;;  %1188 = vrot.lane.b32.xlu0 %v1182_v2, %s2105_s19  ;;  %v909_v49 = vrot.slane %v2348_v15, %v2276_v35 }
 0x80c   : > { %v1118_v4 = vpack.c.bf16 %v2390_v5, %v2390_v5  ;;  %v1100_v30 = vrot.slane %v2390_v5, %v2276_v35 }
 0x80e   : > { %1124 = vrot.lane.b32.xlu1 %v1118_v4, %s2105_s19 }
 0x87c   : > { %v1189_v6 = vpop.permute.xlu0 %1188 }
 0x87d   : > { %1744 = vmatmul.mubr.msk.bf16.vlgmr.msra.gmra.mxu0 %vm437_vm4, %v1189_v6 }
 0x880   : > { %v1125_v7 = vpop.permute.xlu1 %1124 }
 0x881   : > { %1736 = vmatmul.mubr.msk.bf16.vlgmr.msra.gmra.mxu1 %vm437_vm4, %v1125_v7 }
 0x93d   : > { %v1239_v10 = vpop.f32.mrf.mxu0 }
 0x93e   : > { %v1248_v11 = vadd.f32 %v1246_v9, %v1239_v10 }
 0x93f   : > { %v1745_v12 = vpop.f32.mrf.mxu0 }
 0x940   : > { %1900 = vtanh.f32 %v1248_v11  ;;  %v1638_v25 = vmul.f32 -1.442695, %v1248_v11 }
 0x941   : > { %v1175_v14 = vpop.f32.mrf.mxu1  ;;  %v1242_v16 = vpop.f32.mrf.mxu0 }
 0x942   : > { %v1181_v17 = vadd.f32 %v1175_v14, %v1116_v13 }
 0x943   : > { %v1737_v19 = vpop.f32.mrf.mxu1  ;;  %v1746_v20 = vpop.f32.mrf.mxu0 }
 0x944   : > { %1902 = vtanh.f32 %v1181_v17  ;;  %v1637_v26 = vmul.f32 -1.442695, %v1181_v17 }
 0x945   : > { %v1178_v21 = vpop.f32.mrf.mxu1  ;;  %1904 = vpow2.f32 %v1638_v25 }
 0x946   : > { %1906 = vpow2.f32 %v1637_v26 }
 0x947   : > { %v1738_v22 = vpop.f32.mrf.mxu1 }
 0x94d   : > { %v1901_v23 = vpop.eup %1900 }
 0x94e   : > { %1282 = vrot.lane.b32.xlu0 %v1901_v23, %s2104_s17 }
 0x951   : > { %v1903_v24 = vpop.eup %1902 }
 0x952   : > { %1258 = vrot.lane.b32.xlu1 %v1903_v24, %s2104_s17  ;;  %v1905_v27 = vpop.eup %1904 }
 0x953   : > { %v1276_v28 = vadd.f32 1.0, %v1905_v27  ;;  %v1907_v29 = vpop.eup %1906 }
 0x954   : > { %v1252_v31 = vadd.f32 1.0, %v1907_v29 }
 0x955   : > { %1908 = vrcp.f32 %v1276_v28 }
 0x956   : > { %1910 = vrcp.f32 %v1252_v31 }
 0x962   : > { %v1909_v32 = vpop.eup %1908 }
 0x963   : > { %v1911_v37 = vpop.eup %1910  ;;  %v1280_v40 = vmul.f32 %v1909_v32, %v2369_v54 }
 0x964   : > { %v1256_v43 = vmul.f32 %v1911_v37, %v2373_v57 }
 0x9c0   : > { %v1283_v34 = vpop.permute.xlu0 %1282 }
 0x9c1   : > { %v1285_v36 = vmul.f32 %v1909_v32, %v1283_v34 }
 0x9c3   : > { %1287 = vrot.lane.b32.xlu0 %v1285_v36, %s2105_s19 }
 0x9c4   : > { %v1259_v38 = vpop.permute.xlu1 %1258 }
 0x9c5   : > { %v1261_v39 = vmul.f32 %v1911_v37, %v1259_v38 }
 0x9c7   : > { %1263 = vrot.lane.b32.xlu1 %v1261_v39, %s2105_s19 }
 0xa35   : > { %v1288_v41 = vpop.permute.xlu0 %1287 }
 0xa36   : > { %v1290_v42 = vadd.f32 %v1288_v41, %v1280_v40 }
 0xa38   : > { %1912 = vtanh.f32 %v1290_v42  ;;  %v1381_v1 = vrot.slane %v1290_v42, %v2276_v35 }
 0xa39   : > { %v1264_v44 = vpop.permute.xlu1 %1263 }
 0xa3a   : > { %v2404_v45 = vadd.f32 %v1264_v44, %v1256_v43 }
 0xa3c   : > { %1914 = vtanh.f32 %v2404_v45 }
 0xa45   : > { %v1913_v46 = vpop.eup %1912 }
 0xa46   : > { %1293 = vrot.lane.b32.xlu0 %v1913_v46, %s2104_s17 }
 0xa49   : > { %v1915_v48 = vpop.eup %1914 }
 0xa4a   : > { %1269 = vrot.lane.b32.xlu1 %v1915_v48, %s2104_s17  ;;  %707 = vrot.lane.b32.xlu0 %v706_v47, %s2105_s19  ;;  %s2106_s17 = smov 96  }
 0xa4e   : > { %910 = vrot.lane.b32.xlu1 %v909_v49, %s2105_s19  ;;  %1111 = vrot.lane.b32.xlu0 %v1110_v50, %s2105_s19 }
 0xa52   : > { %697 = vrot.lane.b32.xlu0 %v696_v51, %s2105_s19 }
 0xa56   : > { %1101 = vrot.lane.b32.xlu0 %v1100_v30, %s2105_s19 }
 0xab8   : > { %v1294_v52 = vpop.permute.xlu0 %1293 }
 0xab9   : > { %v1296_v53 = vmul.f32 %v1909_v32, %v1294_v52 }
 0xabb   : > { %v1311_v15 = vrot.slane %v1296_v53, %v2276_v35 }
 0xabc   : > { %v1270_v54 = vpop.permute.xlu1 %1269  ;;  %v708_v55 = vpop.permute.xlu0 %707 }
 0xabd   : > { %711 = vst.msk [vmem:[#allocation4 + $0x3] sm:$0x1] %vm700_vm6, %v708_v55  ;;  %1312 = vrot.lane.b32.xlu1 %v1311_v15, %s2105_s19  ;;  %v1272_v56 = vmul.f32 %v1911_v37, %v1270_v54 }
 0xabf   : > { %v1301_v59 = vrot.slane %v1272_v56, %v2276_v35 }
 0xac0   : > { %v911_v57 = vpop.permute.xlu1 %910  ;;  %v1112_v58 = vpop.permute.xlu0 %1111 }
 0xac1   : > { %914 = vst.msk [vmem:[#allocation4 + $0x2] sm:$0x1] %vm700_vm6, %v911_v57  ;;  %1115 = vst.msk [vmem:[#allocation4 + $0x1] sm:$0x1] %vm700_vm6, %v1112_v58  ;;  %900 = vrot.lane.b32.xlu1 %v899_v33, %s2105_s19 }
 0xac4   : > { %v698_v60 = vpop.permute.xlu0 %697  ;;  %v1642_v63 = vld [vmem:[#allocation4 + $0x3] ss:$0 sm:$0xff] }
 0xac5   : > { %701 = vst.msk [vmem:[#allocation3] sm:$0x1] %vm700_vm6, %v698_v60  ;;  %1302 = vrot.lane.b32.xlu1 %v1301_v59, %s2105_s19 }
 0xac8   : > { %v1102_v61 = vpop.permute.xlu0 %1101  ;;  %v1641_v62 = vld [vmem:[#allocation4 + $0x2] ss:$0 sm:$0xff]  ;;  %v1640_v18 = vld [vmem:[#allocation4 + $0x1] ss:$0 sm:$0xff] }
 0xac9   : > { %1105 = vst.msk [vmem:[#allocation3 + $0x2] sm:$0x1] %vm700_vm6, %v1102_v61  ;;  %1348 = vrot.lane.b32.xlu0 %v1641_v62, %s2105_s19  ;;  %1346 = vrot.lane.b32.xlu1 %v1640_v18, %s2105_s19 }
 0xacd   : > { %1350 = vrot.lane.b32.xlu1 %v1642_v63, %s2105_s19 }
 0xad1   : > { %1382 = vrot.lane.b32.xlu1 %v1381_v1, %s2106_s17 }
 0xb2f   : > { %v1313_v0 = vpop.permute.xlu1 %1312 }
 0xb30   : > { %1315 = vst.msk [vmem:[#allocation4] sm:$0x1] %vm700_vm6, %v1313_v0  ;;  %1643 = vst.msk [vmem:[%s310_s18 + $0x1] sm:$0x1] %vm700_vm6, %v1313_v0 }
 0xb33   : > { %v901_v2 = vpop.permute.xlu1 %900 }
 0xb34   : > { %904 = vst.msk [vmem:[#allocation3 + $0x1] sm:$0x1] %vm700_vm6, %v901_v2 }
 0xb37   : > { %v1303_v3 = vpop.permute.xlu1 %1302  ;;  %v1639_v5 = vld [vmem:[#allocation4] ss:$0 sm:$0xff] }
 0xb38   : > { %1306 = vst.msk [vmem:[#allocation3 + $0x3] sm:$0x1] %vm700_vm6, %v1303_v3  ;;  %1365 = vst.msk [vmem:[%s310_s18] sm:$0x1] %vm700_vm6, %v1303_v3  ;;  %1344 = vrot.lane.b32.xlu0 %v1639_v5, %s2105_s19 }
 0xb39   : > { %1981 = shalt.err (!%p1978_p3)
}
 0xb3a   : > { %s1982_s19 = scalar_lea.hbm %s2459_s9, 32  ;;  %s1986_s23 = scalar_lea.hbm %s2603_s6, 64 }
 0xb3b   : > { %p1983_p2 = scmp.ne.s32.totalorder %s2459_s9, %s1982_s19  ;;  %p1987_p6 = scmp.lt.s32.totalorder %s2459_s9, %s2603_s6 }
 0xb3c   : > { %p1988_p9 = scmp.lt.s32.totalorder %s1986_s23, %s1982_s19 }
 0xb3d   : > { %p1984_p4 = pnand %p1983_p2, %p2192_p5 }
 0xb3e   : > { %p1989_p7 = por %p1988_p9, %p1987_p6 }
 0xb3f   : > { %p1985_p13 = pneg %p1984_p4 }
 0xb41   : > { %p1990_p10 = pnand %p1989_p7, %p1985_p13 }
 0xb43   : > { %1993 = shalt.err (!%p1990_p10)
}
 0xb44   : > { %s2609_s29 = smov 16   ;;  %s2611_s22 = smov 1   ;;  %v1372_v4 = vrot.slane %v2404_v45, %v2276_v35  ;;  %vm1360_vm7 = vcmask 516096   ;;  %v1317_v6 = vld [vmem:[#allocation3 + $0x1] sm:$0x1]  ;;  %v1347_v7 = vpop.permute.xlu1 %1346  ;;  %v1349_v9 = vpop.permute.xlu0 %1348 }
 0xb45   : > { %1756 = dma.vmem_to_hbm [thread:$0]  (%p2192_p5), %s2451_s20, 32, %s2459_s9, %s2465_s13, %s2609_s29, %s2609_s29, %s2611_s22   ;;  %v1318_v8 = vld [vmem:[#allocation3 + $0x2] sm:$0x1]  ;;  %v1357_v10 = vsel %vm437_vm4, %v1317_v6, %v1347_v7  ;;  %v1319_v35 = vld [vmem:[#allocation3 + $0x3] sm:$0x1] }
 0xb46   : > { %v1358_v11 = vsel %vm437_vm4, %v1318_v8, %v1349_v9  ;;  %1373 = vrot.lane.b32.xlu0 %v1372_v4, %s2106_s17  ;;  %s2625_s16 = sshll.u32 %s2442_s15, 2  ;;  %s2626_s20 = sshll.u32 %s2442_s15, 1  ;;  %v1316_v16 = vld [vmem:[#allocation3] sm:$0x1] }
 0xb47   : > { %s303_s14 = scalar_lea.vmem [#allocation10], %s2625_s16  ;;  %s2504_s9 = scalar_lea.vmem [#allocation13], %s2626_s20 }
 0xb48   : > { %1362 = vst.msk [vmem:[%s303_s14 + $0x1] sm:$0x1] %vm1360_vm7, %v1357_v10  ;;  %1363 = vst.msk [vmem:[%s303_s14 + $0x2] sm:$0x1] %vm1360_vm7, %v1358_v11  ;;  %v1351_v12 = vpop.permute.xlu1 %1350  ;;  %s1411_s17 = sshll.u32 %s303_s14, 4  ;;  %s1656_s8 = sshll.u32 %s2173_s28, 6  ;;  %s2510_s17 = int_to_ptr.vmem [resolvable:$true] %s1411_s17 }
 0xb49   : > { %v1359_v13 = vsel %vm437_vm4, %v1319_v35, %v1351_v12  ;;  %s1443_s19 = sshll.u32 %s2504_s9, 4  ;;  %s2515_s23 = scalar_lea.hbm %s2602_s5, %s1656_s8  ;;  %s2518_s19 = int_to_ptr.vmem [resolvable:$true] %s1443_s19 }
 0xb4a   : > { %1364 = vst.msk [vmem:[%s303_s14 + $0x3] sm:$0x1] %vm1360_vm7, %v1359_v13  ;;  %s2627_s16 = sshll.u32 %s2173_s28, 5  ;;  %s1388_s0 = scalar_lea.sflag [#allocation7], %s2442_s15 }
 0xb4b   : > { %s2526_s22 = scalar_lea.hbm %s2604_s7, %s2627_s16  ;;  %s1994_s1 = scalar_lea.vmem %s2510_s17, 64 }
 0xb4c   : > { %v1383_v14 = vpop.permute.xlu1 %1382  ;;  %p1995_p12 = scmp.ne.s32.totalorder %s2510_s17, %s1994_s1  ;;  %s2110_s8 = smov [#allocation10]  }
 0xb4d   : > { %1644 = vst.msk [vmem:[%s2504_s9 + $0x1] sm:$0x1] %vm700_vm6, %v1383_v14  ;;  %s1998_s18 = sshll.u32 %s2110_s8, 4  ;;  %s1999_s18 = int_to_ptr.vmem [resolvable:$false] %s1998_s18 }
 0xb4e   : > { %p1996_p8 = pnand %p1995_p12, %p2192_p5  ;;  %s2000_s21 = scalar_lea.vmem %s1999_s18, 128 }
 0xb4f   : > { %p2001_p0 = scmp.lt.s32.totalorder %s2510_s17, %s1999_s18  ;;  %p2002_p1 = scmp.lt.s32.totalorder %s2000_s21, %s1994_s1 }
 0xb50   : > { %p1997_p11 = pneg %p1996_p8 }
 0xb51   : > { %p2003_p3 = por %p2002_p1, %p2001_p0 }
 0xb53   : > { %p2004_p2 = pnand %p2003_p3, %p1997_p11 }
 0xbaa   : > { %v1345_v17 = vpop.permute.xlu0 %1344 }
 0xbab   : > { %v1356_v19 = vsel %vm437_vm4, %v1316_v16, %v1345_v17 }
 0xbac   : > { %1361 = vst.msk [vmem:[%s303_s14] sm:$0x1] %vm1360_vm7, %v1356_v19 }
 0xbad   : > { %2007 = shalt.err (!%p2004_p2)
}
 0xbae   : > { %s2008_s28 = scalar_lea.hbm %s2515_s23, 64  ;;  %s2012_s14 = scalar_lea.hbm %s2602_s5, 128 }
 0xbaf   : > { %p2009_p4 = scmp.ne.s32.totalorder %s2515_s23, %s2008_s28  ;;  %p2013_p9 = scmp.lt.s32.totalorder %s2515_s23, %s2602_s5 }
 0xbb0   : > { %p2014_p7 = scmp.lt.s32.totalorder %s2012_s14, %s2008_s28 }
 0xbb1   : > { %p2010_p13 = pnand %p2009_p4, %p2192_p5 }
 0xbb2   : > { %p2015_p10 = por %p2014_p7, %p2013_p9 }
 0xbb3   : > { %p2011_p6 = pneg %p2010_p13 }
 0xbb5   : > { %p2016_p12 = pnand %p2015_p10, %p2011_p6 }
 0xbb7   : > { %2019 = shalt.err (!%p2016_p12)
}
 0xbb8   : > { %s2628_s1 = smov 1   ;;  %s2629_s8 = smov 16   ;;  %v1374_v20 = vpop.permute.xlu0 %1373 }
 0xbb9   : > { %1755 = dma.vmem_to_hbm [thread:$0]  (%p2192_p5), %s2510_s17, 64, %s2515_s23, %s1388_s0, %s2629_s8, %s2629_s8, %s2628_s1  }
 0xbba   : > { %1376 = vst.msk [vmem:[%s2504_s9] sm:$0x1] %vm700_vm6, %v1374_v20  ;;  %s2020_s18 = scalar_lea.vmem %s2518_s19, 32  ;;  %s2111_s21 = smov [#allocation13]  }
 0xbbb   : > { %p2021_p8 = scmp.ne.s32.totalorder %s2518_s19, %s2020_s18  ;;  %s2024_s28 = sshll.u32 %s2111_s21, 4  ;;  %s2025_s28 = int_to_ptr.vmem [resolvable:$false] %s2024_s28 }
 0xbbc   : > { %s2026_s15 = scalar_lea.vmem %s2025_s28, 64  ;;  %p2027_p1 = scmp.lt.s32.totalorder %s2518_s19, %s2025_s28 }
 0xbbd   : > { %p2022_p11 = pnand %p2021_p8, %p2192_p5  ;;  %p2028_p3 = scmp.lt.s32.totalorder %s2026_s15, %s2020_s18 }
 0xbbf   : > { %p2023_p0 = pneg %p2022_p11  ;;  %p2029_p2 = por %p2028_p3, %p2027_p1 }
 0xbc1   : > { %p2030_p4 = pnand %p2029_p2, %p2023_p0 }
 0xbc3   : > { %2033 = shalt.err (!%p2030_p4)
}
 0xbc4   : > { %s2034_s0 = scalar_lea.hbm %s2526_s22, 32  ;;  %s2038_s23 = scalar_lea.hbm %s2604_s7, 64 }
 0xbc5   : > { %p2035_p13 = scmp.ne.s32.totalorder %s2526_s22, %s2034_s0  ;;  %p2039_p7 = scmp.lt.s32.totalorder %s2526_s22, %s2604_s7 }
 0xbc6   : > { %p2040_p10 = scmp.lt.s32.totalorder %s2038_s23, %s2034_s0 }
 0xbc7   : > { %p2036_p6 = pnand %p2035_p13, %p2192_p5 }
 0xbc8   : > { %p2041_p12 = por %p2040_p10, %p2039_p7 }
 0xbc9   : > { %p2037_p9 = pneg %p2036_p6 }
 0xbcb   : > { %p2042_p8 = pnand %p2041_p12, %p2037_p9 }
 0xbcd   : > { %2045 = shalt.err (!%p2042_p8)
}
 0xbce   : > { %1757 = dma.vmem_to_hbm [thread:$0]  (%p2192_p5), %s2518_s19, 32, %s2526_s22, %s2465_s13, %s2629_s8, %s2629_s8, %s2628_s1  }
 0xbcf PF: > { %p1782_p11 = scmp.ge.s32.totalorder %s2092_s27, 2  ;;  %s1458_s16 = sand.u32 1, %s2080_s24  }
 0xbd0   : > { %p2630_p0 = scmp.ne.s32.totalorder %s2616_s12, 0  ;;  %s1459_s20 = scalar_lea.sflag [#allocation7], %s1458_s16 }
 0xbd2   : > { %p1769_p1 = pnand %p1782_p11, %p2630_p0 }
 0xbd4   : > { %p1770_p3 = pneg %p1769_p1 }
 0xbd6   : > { %2071 = dma.done.wait (%p1770_p3), %s1459_s20, 64  }
 0xbd7   : > { %2073 = vsyncadd (%p1770_p3), %s1459_s20, 4294967232  ;;  %s2631_s11 = sadd.s32 4294967294, %s2092_s27  }
 0xbd8   : > { %s1467_s18 = sand.u32 1, %s2631_s11  }
 0xbd9   : > { %s1468_s21 = scalar_lea.sflag [#allocation12], %s1467_s18 }
 0xbda   : > { %2075 = dma.done.wait (%p1770_p3), %s1468_s21, 64  }
 0xbdb   : > { %2077 = vsyncadd (%p1770_p3), %s1468_s21, 4294967232  ;;  %p23_p5 = scmp.ge.s32.totalorder %s2177_s30, 4   ;;  %s2632_s24 = smov %s2084_s25 }
 0xbdc   : > { %s2633_s25 = smov %s2088_s26  ;;  %s2634_s26 = smov %s2190_s10 }
 0xbdd   : > { %s2635_s27 = smov %s2177_s30  ;;  %25 = sbr.rel (!%p23_p5) target bundleno = 10 (0xa), region = 127 }
 0xbe2   :  { %1482 = vsyncpa [#allocation6], 1 }
 0xbe3   :  { %1484 = vsyncpa [#allocation6 + $0x1], 1 }
 0xbe4   :  { %1485 = vsyncpa [#allocation9], 1 }
 0xbe5   :  { %1486 = vsyncpa [#allocation7], 1 }
 0xbe6   :  { %1488 = vsyncpa [#allocation7 + $0x1], 1 }
 0xbe7   :  { %1489 = vsyncpa [#allocation12], 1 }
 0xbe8   :  { %1491 = vsyncpa [#allocation12 + $0x1], 1 }

</bundles_post_ra>
